<compile_context>
chip_gen: v6e
topology: v6e:2x2x1
jax: 0.10.0
libtpu: 0.0.40
codegen_flags: <defaults>
</compile_context>

<pallas_src>
import jax
import jax.numpy as jnp
from jax.experimental import pallas as pl
from jax.experimental.pallas import tpu as pltpu

N_FEATURES = 7     # n_experiment_features
HIDDEN = 32        # n_hidden_layer
N_LAYERS = 2       # encoder_layers
N_OUT = 1          # n_out_labels
SEQ = 8            # number of trade days in the example
G4 = 4 * HIDDEN    # 128 gate lanes


def monthly_predictor_kernel(
    x_ref,        # (T, H)   f32   input, features in lanes 0:7, rest zero-padded
    hc_ref,       # (4, H)   f32   rows: h0, h1, c0, c1 (initial context)
    w_slab_ref,   # (5, H, 4H) bf16  [w_ih0, w_hh0, w_ih1, w_hh1, w_emb(padded)]
    small_ref,    # (8, 4H)  f32   r0: b_emb(0:H), r1: b0, r2: b1, r3: w_gen(0:H), r4: b_gen(lane 0)
    out_ref,      # (8, 4H)  f32   r0..3: h0,h1,c0,c1 (lanes 0:H), r4..5: pred (lane 0)
):
    T = x_ref.shape[0]
    H = HIDDEN

    # ---- Unpack weight slabs (static slices, prologue only).
    w_ih0 = w_slab_ref[0]                  # (H, 4H) bf16
    w_hh0 = w_slab_ref[1]
    w_ih1 = w_slab_ref[2]
    w_hh1 = w_slab_ref[3]
    w_emb = w_slab_ref[4][:, 0:H]          # (H, H) bf16 (rows >= N_FEATURES are zero)

    b_emb = small_ref[0:1, 0:H]            # (1, H)  f32
    b0 = small_ref[1:2, :]                 # (1, 4H) f32
    b1 = small_ref[2:3, :]                 # (1, 4H) f32
    w_gen = small_ref[3:4, 0:H]            # (1, H)  f32
    b_gen = small_ref[4:5, 0:1]            # (1, 1)  f32

    # ---- Hoisted, non-recurrent work: one batched MXU pass over all T rows.
    # e = x @ W_emb^T + b_emb ; gx0 = e @ W_ih_l0^T + (b_ih0 + b_hh0)
    x_bf = x_ref[...].astype(jnp.bfloat16)                               # (T, H)
    e = jnp.dot(x_bf, w_emb, preferred_element_type=jnp.float32) + b_emb  # (T, H) f32
    gx0 = (
        jnp.dot(e.astype(jnp.bfloat16), w_ih0, preferred_element_type=jnp.float32)
        + b0
    )                                                                    # (T, 4H) f32

    def activate(gates):
        # Full-vreg nonlinearities (EUP slot), then static lane slices.
        sig = jax.nn.sigmoid(gates)
        th = jnp.tanh(gates)
        i = sig[:, 0 * H:1 * H]
        f = sig[:, 1 * H:2 * H]
        g = th[:, 2 * H:3 * H]
        o = sig[:, 3 * H:4 * H]
        return i, f, g, o

    h0 = hc_ref[0:1, :]
    h1 = hc_ref[1:2, :]
    c0 = hc_ref[2:3, :]
    c1 = hc_ref[3:4, :]

    # ---- Fully-unrolled recurrence (T is static). Per step only three
    # (1,H)x(H,4H) bf16 single-pass matmuls remain; the h1 @ w_hh1 push only
    # depends on h1_{t-1}, so it overlaps the layer-0 step.
    for t in range(T):
        # layer-1 recurrent contribution (independent of layer-0 step t)
        g1_hh = jnp.dot(
            h1.astype(jnp.bfloat16), w_hh1, preferred_element_type=jnp.float32
        )

        # layer 0: hidden-to-hidden matmul only; input contribution precomputed
        g0 = gx0[t:t + 1, :] + jnp.dot(
            h0.astype(jnp.bfloat16), w_hh0, preferred_element_type=jnp.float32
        )
        i0, f0, gg0, o0 = activate(g0)
        c0 = f0 * c0 + i0 * gg0
        h0 = o0 * jnp.tanh(c0)

        # layer 1: split input/hidden matmuls (no concat, no false join)
        g1 = (
            jnp.dot(h0.astype(jnp.bfloat16), w_ih1, preferred_element_type=jnp.float32)
            + g1_hh
            + b1
        )
        i1, f1, gg1, o1 = activate(g1)
        c1 = f1 * c1 + i1 * gg1
        h1 = o1 * jnp.tanh(c1)

    # ---- Generator on h_n: one (2,H) VPU multiply + one cross-lane reduce.
    state = jnp.concatenate([h0, h1, c0, c1], axis=0)                     # (4, H)
    p = jnp.sum(state[0:2, :] * w_gen, axis=-1, keepdims=True) + b_gen    # (2, 1)

    # ---- Single merged output slab, one full unmasked (8,128) store.
    p_pad = jnp.concatenate([p, jnp.zeros((2, H - 1), jnp.float32)], axis=-1)   # (2, H)
    zrows = jnp.zeros((2, H), jnp.float32)
    slab_h = jnp.concatenate([state, p_pad, zrows], axis=0)                     # (8, H)
    out_ref[...] = jnp.concatenate(
        [slab_h, jnp.zeros((8, G4 - H), jnp.float32)], axis=-1
    )                                                                           # (8, 4H)


def monthly_predictor_forward(x, params, target=None, previous_context=None):
    """Mirror of MonthlyPredictor.forward. Returns (pred, loss, (h_n, c_n))."""
    if previous_context is None:
        h_init = jnp.zeros((N_LAYERS, 1, HIDDEN), jnp.float32)
        c_init = jnp.zeros((N_LAYERS, 1, HIDDEN), jnp.float32)
    else:
        h_init, c_init = previous_context

    (w_emb, b_emb, w_ih0, w_hh0, b0, w_ih1, w_hh1, b1, w_gen, b_gen) = params
    T = x.shape[0]

    # ---- Host-side packing (tiny, parameter-only; ideally cached with params).
    # Input padded to H lanes so the embedding matmul reads straight from the slab.
    x_pad = jnp.concatenate(
        [x.astype(jnp.float32), jnp.zeros((T, HIDDEN - N_FEATURES), jnp.float32)],
        axis=-1,
    )
    # One bf16 weight slab: 4 gate weights + zero-padded embedding weight.
    w_emb_pad = (
        jnp.zeros((HIDDEN, G4), jnp.float32).at[:N_FEATURES, :HIDDEN].set(w_emb)
    )
    w_slab = jnp.stack([w_ih0, w_hh0, w_ih1, w_hh1, w_emb_pad], axis=0).astype(
        jnp.bfloat16
    )
    # One f32 slab for all small parameters.
    small = jnp.zeros((8, G4), jnp.float32)
    small = small.at[0, :HIDDEN].set(b_emb[0])
    small = small.at[1, :].set(b0[0])
    small = small.at[2, :].set(b1[0])
    small = small.at[3, :HIDDEN].set(w_gen[0])
    small = small.at[4, 0].set(b_gen[0, 0])
    # Initial context folded into one array: rows [h0, h1, c0, c1].
    hc = jnp.concatenate([h_init[:, 0, :], c_init[:, 0, :]], axis=0)

    vmem = pl.BlockSpec(memory_space=pltpu.MemorySpace.VMEM)
    out = pl.pallas_call(
        monthly_predictor_kernel,
        out_shape=jax.ShapeDtypeStruct((8, G4), jnp.float32),
        in_specs=[vmem, vmem, vmem, vmem],
        out_specs=vmem,
    )(x_pad, hc, w_slab, small)
    # TODO(synk): if batches of independent sequences exist, add a leading
    # parallel grid axis (dimension_semantics=("parallel",)) to use v7x's
    # second TensorCore; the module itself is single-sequence.

    pred = out[4:4 + N_LAYERS, 0]                                   # (2,)  == .view(-1)
    h_n = out[0:N_LAYERS, :HIDDEN].reshape(N_LAYERS, 1, HIDDEN)
    c_n = out[N_LAYERS:2 * N_LAYERS, :HIDDEN].reshape(N_LAYERS, 1, HIDDEN)

    loss = jnp.float32(0.0)
    if target is not None:
        # nn.MSELoss (mean reduction) — tiny 2-element reduction, kept as glue.
        loss = jnp.mean((pred - target) ** 2)
    return pred, loss, (h_n, c_n)


def init_params(key):
    """Deterministic parameter init matching the PyTorch module's shapes
    (matmul weights stored transposed to (in, out); generator.weight kept as
    (n_out, H); LSTM biases pre-summed b_ih + b_hh)."""
    ks = jax.random.split(key, 12)
    s = 1.0 / jnp.sqrt(jnp.float32(HIDDEN))

    def u(k, shape):
        return jax.random.uniform(k, shape, jnp.float32, -s, s)

    w_emb = u(ks[0], (N_FEATURES, HIDDEN))          # emb.weight^T
    b_emb = u(ks[1], (1, HIDDEN))                   # emb.bias
    w_ih0 = u(ks[2], (HIDDEN, 4 * HIDDEN))          # weight_ih_l0^T
    w_hh0 = u(ks[3], (HIDDEN, 4 * HIDDEN))          # weight_hh_l0^T
    b0 = u(ks[4], (1, 4 * HIDDEN)) + u(ks[5], (1, 4 * HIDDEN))   # bias_ih_l0 + bias_hh_l0
    w_ih1 = u(ks[6], (HIDDEN, 4 * HIDDEN))          # weight_ih_l1^T
    w_hh1 = u(ks[7], (HIDDEN, 4 * HIDDEN))          # weight_hh_l1^T
    b1 = u(ks[8], (1, 4 * HIDDEN)) + u(ks[9], (1, 4 * HIDDEN))   # bias_ih_l1 + bias_hh_l1
    w_gen = u(ks[10], (N_OUT, HIDDEN))              # generator.weight (1, H)
    b_gen = u(ks[11], (1, N_OUT))                   # generator.bias
    return (w_emb, b_emb, w_ih0, w_hh0, b0, w_ih1, w_hh1, b1, w_gen, b_gen)


if __name__ == "__main__":
    params = init_params(jax.random.PRNGKey(0))
    x = jax.random.normal(jax.random.PRNGKey(1), (SEQ, N_FEATURES), jnp.float32)
    target = jax.random.normal(jax.random.PRNGKey(2), (N_LAYERS,), jnp.float32)

    pred, loss, (h_n, c_n) = monthly_predictor_forward(x, params, target=target)
    jax.block_until_ready((pred, loss, h_n, c_n))

    assert pred.shape == (N_LAYERS,)
    assert h_n.shape == (N_LAYERS, 1, HIDDEN)
    assert c_n.shape == (N_LAYERS, 1, HIDDEN)
    assert bool(jnp.isfinite(loss))
    print("KERNEL_OK")
</pallas_src>

<mosaic_0001>
module attributes {stable_mosaic.version = 11 : i64} {
  func.func @monthly_predictor_kernel(%arg0: memref<8x32xf32, #tpu.memory_space<vmem>>, %arg1: memref<4x32xf32, #tpu.memory_space<vmem>>, %arg2: memref<5x32x128xbf16, #tpu.memory_space<vmem>>, %arg3: memref<8x128xf32, #tpu.memory_space<vmem>>, %arg4: memref<8x128xf32, #tpu.memory_space<vmem>>) attributes {dimension_semantics = [], scalar_prefetch = 0 : i64, scratch_operands = 0 : i64, tpu.core_type = #tpu.core_type<tc>} {
    %c0 = arith.constant 0 : index
    %c0_0 = arith.constant 0 : index
    %c0_1 = arith.constant 0 : index
    %0 = vector.load %arg2[%c0, %c0_0, %c0_1] : memref<5x32x128xbf16, #tpu.memory_space<vmem>>, vector<1x32x128xbf16>
    %1 = vector.shape_cast %0 : vector<1x32x128xbf16> to vector<32x128xbf16>
    %c1 = arith.constant 1 : index
    %c0_2 = arith.constant 0 : index
    %c0_3 = arith.constant 0 : index
    %2 = vector.load %arg2[%c1, %c0_2, %c0_3] : memref<5x32x128xbf16, #tpu.memory_space<vmem>>, vector<1x32x128xbf16>
    %3 = vector.shape_cast %2 : vector<1x32x128xbf16> to vector<32x128xbf16>
    %c2 = arith.constant 2 : index
    %c0_4 = arith.constant 0 : index
    %c0_5 = arith.constant 0 : index
    %4 = vector.load %arg2[%c2, %c0_4, %c0_5] : memref<5x32x128xbf16, #tpu.memory_space<vmem>>, vector<1x32x128xbf16>
    %5 = vector.shape_cast %4 : vector<1x32x128xbf16> to vector<32x128xbf16>
    %c3 = arith.constant 3 : index
    %c0_6 = arith.constant 0 : index
    %c0_7 = arith.constant 0 : index
    %6 = vector.load %arg2[%c3, %c0_6, %c0_7] : memref<5x32x128xbf16, #tpu.memory_space<vmem>>, vector<1x32x128xbf16>
    %7 = vector.shape_cast %6 : vector<1x32x128xbf16> to vector<32x128xbf16>
    %c4 = arith.constant 4 : index
    %c0_8 = arith.constant 0 : index
    %c0_9 = arith.constant 0 : index
    %8 = vector.load %arg2[%c4, %c0_8, %c0_9] : memref<5x32x128xbf16, #tpu.memory_space<vmem>>, vector<1x32x128xbf16>
    %9 = vector.shape_cast %8 : vector<1x32x128xbf16> to vector<32x128xbf16>
    %10 = vector.extract_strided_slice %9 {offsets = [0, 0], sizes = [32, 32], strides = [1, 1]} : vector<32x128xbf16> to vector<32x32xbf16>
    %c0_10 = arith.constant 0 : index
    %c0_11 = arith.constant 0 : index
    %11 = vector.load %arg3[%c0_10, %c0_11] : memref<8x128xf32, #tpu.memory_space<vmem>>, vector<1x32xf32>
    %c1_12 = arith.constant 1 : index
    %c0_13 = arith.constant 0 : index
    %12 = vector.load %arg3[%c1_12, %c0_13] : memref<8x128xf32, #tpu.memory_space<vmem>>, vector<1x128xf32>
    %c2_14 = arith.constant 2 : index
    %c0_15 = arith.constant 0 : index
    %13 = vector.load %arg3[%c2_14, %c0_15] : memref<8x128xf32, #tpu.memory_space<vmem>>, vector<1x128xf32>
    %c3_16 = arith.constant 3 : index
    %c0_17 = arith.constant 0 : index
    %14 = vector.load %arg3[%c3_16, %c0_17] : memref<8x128xf32, #tpu.memory_space<vmem>>, vector<1x32xf32>
    %c4_18 = arith.constant 4 : index
    %c0_19 = arith.constant 0 : index
    %15 = vector.load %arg3[%c4_18, %c0_19] : memref<8x128xf32, #tpu.memory_space<vmem>>, vector<1x1xf32>
    %c0_20 = arith.constant 0 : index
    %c0_21 = arith.constant 0 : index
    %16 = vector.load %arg0[%c0_20, %c0_21] : memref<8x32xf32, #tpu.memory_space<vmem>>, vector<8x32xf32>
    %17 = arith.truncf %16 : vector<8x32xf32> to vector<8x32xbf16>
    %cst = arith.constant dense<0.000000e+00> : vector<8x32xf32>
    %18 = tpu.matmul %17, %10, %cst {dimension_numbers = #tpu.dot_dimension_numbers<[1], [0], [0], [1], [0, 0, 1, 1], [], []>} : vector<8x32xbf16>, vector<32x32xbf16>, vector<8x32xf32> -> vector<8x32xf32>
    %19 = vector.broadcast %11 : vector<1x32xf32> to vector<8x32xf32>
    %20 = arith.addf %18, %19 : vector<8x32xf32>
    %21 = arith.truncf %20 : vector<8x32xf32> to vector<8x32xbf16>
    %cst_22 = arith.constant dense<0.000000e+00> : vector<8x128xf32>
    %22 = tpu.matmul %21, %1, %cst_22 {dimension_numbers = #tpu.dot_dimension_numbers<[1], [0], [0], [1], [0, 0, 1, 1], [], []>} : vector<8x32xbf16>, vector<32x128xbf16>, vector<8x128xf32> -> vector<8x128xf32>
    %23 = vector.broadcast %12 : vector<1x128xf32> to vector<8x128xf32>
    %24 = arith.addf %22, %23 : vector<8x128xf32>
    %c0_23 = arith.constant 0 : index
    %c0_24 = arith.constant 0 : index
    %25 = vector.load %arg1[%c0_23, %c0_24] : memref<4x32xf32, #tpu.memory_space<vmem>>, vector<1x32xf32>
    %c1_25 = arith.constant 1 : index
    %c0_26 = arith.constant 0 : index
    %26 = vector.load %arg1[%c1_25, %c0_26] : memref<4x32xf32, #tpu.memory_space<vmem>>, vector<1x32xf32>
    %c2_27 = arith.constant 2 : index
    %c0_28 = arith.constant 0 : index
    %27 = vector.load %arg1[%c2_27, %c0_28] : memref<4x32xf32, #tpu.memory_space<vmem>>, vector<1x32xf32>
    %c3_29 = arith.constant 3 : index
    %c0_30 = arith.constant 0 : index
    %28 = vector.load %arg1[%c3_29, %c0_30] : memref<4x32xf32, #tpu.memory_space<vmem>>, vector<1x32xf32>
    %29 = arith.truncf %26 : vector<1x32xf32> to vector<1x32xbf16>
    %cst_31 = arith.constant dense<0.000000e+00> : vector<1x128xf32>
    %30 = tpu.matmul %29, %7, %cst_31 {dimension_numbers = #tpu.dot_dimension_numbers<[1], [0], [0], [1], [0, 0, 1, 1], [], []>} : vector<1x32xbf16>, vector<32x128xbf16>, vector<1x128xf32> -> vector<1x128xf32>
    %31 = vector.extract_strided_slice %24 {offsets = [0, 0], sizes = [1, 128], strides = [1, 1]} : vector<8x128xf32> to vector<1x128xf32>
    %32 = arith.truncf %25 : vector<1x32xf32> to vector<1x32xbf16>
    %cst_32 = arith.constant dense<0.000000e+00> : vector<1x128xf32>
    %33 = tpu.matmul %32, %3, %cst_32 {dimension_numbers = #tpu.dot_dimension_numbers<[1], [0], [0], [1], [0, 0, 1, 1], [], []>} : vector<1x32xbf16>, vector<32x128xbf16>, vector<1x128xf32> -> vector<1x128xf32>
    %34 = arith.addf %31, %33 : vector<1x128xf32>
    %35 = arith.negf %34 : vector<1x128xf32>
    %36 = math.exp %35 : vector<1x128xf32>
    %cst_33 = arith.constant 1.000000e+00 : f32
    %37 = vector.broadcast %cst_33 : f32 to vector<1x128xf32>
    %38 = arith.addf %37, %36 : vector<1x128xf32>
    %39 = arith.divf %37, %38 : vector<1x128xf32>
    %40 = math.tanh %34 : vector<1x128xf32>
    %41 = vector.extract_strided_slice %39 {offsets = [0, 0], sizes = [1, 32], strides = [1, 1]} : vector<1x128xf32> to vector<1x32xf32>
    %42 = vector.extract_strided_slice %39 {offsets = [0, 32], sizes = [1, 32], strides = [1, 1]} : vector<1x128xf32> to vector<1x32xf32>
    %43 = vector.extract_strided_slice %40 {offsets = [0, 64], sizes = [1, 32], strides = [1, 1]} : vector<1x128xf32> to vector<1x32xf32>
    %44 = vector.extract_strided_slice %39 {offsets = [0, 96], sizes = [1, 32], strides = [1, 1]} : vector<1x128xf32> to vector<1x32xf32>
    %45 = arith.mulf %42, %27 : vector<1x32xf32>
    %46 = arith.mulf %41, %43 : vector<1x32xf32>
    %47 = arith.addf %45, %46 : vector<1x32xf32>
    %48 = math.tanh %47 : vector<1x32xf32>
    %49 = arith.mulf %44, %48 : vector<1x32xf32>
    %50 = arith.truncf %49 : vector<1x32xf32> to vector<1x32xbf16>
    %cst_34 = arith.constant dense<0.000000e+00> : vector<1x128xf32>
    %51 = tpu.matmul %50, %5, %cst_34 {dimension_numbers = #tpu.dot_dimension_numbers<[1], [0], [0], [1], [0, 0, 1, 1], [], []>} : vector<1x32xbf16>, vector<32x128xbf16>, vector<1x128xf32> -> vector<1x128xf32>
    %52 = arith.addf %51, %30 : vector<1x128xf32>
    %53 = arith.addf %52, %13 : vector<1x128xf32>
    %54 = arith.negf %53 : vector<1x128xf32>
    %55 = math.exp %54 : vector<1x128xf32>
    %cst_35 = arith.constant 1.000000e+00 : f32
    %56 = vector.broadcast %cst_35 : f32 to vector<1x128xf32>
    %57 = arith.addf %56, %55 : vector<1x128xf32>
    %58 = arith.divf %56, %57 : vector<1x128xf32>
    %59 = math.tanh %53 : vector<1x128xf32>
    %60 = vector.extract_strided_slice %58 {offsets = [0, 0], sizes = [1, 32], strides = [1, 1]} : vector<1x128xf32> to vector<1x32xf32>
    %61 = vector.extract_strided_slice %58 {offsets = [0, 32], sizes = [1, 32], strides = [1, 1]} : vector<1x128xf32> to vector<1x32xf32>
    %62 = vector.extract_strided_slice %59 {offsets = [0, 64], sizes = [1, 32], strides = [1, 1]} : vector<1x128xf32> to vector<1x32xf32>
    %63 = vector.extract_strided_slice %58 {offsets = [0, 96], sizes = [1, 32], strides = [1, 1]} : vector<1x128xf32> to vector<1x32xf32>
    %64 = arith.mulf %61, %28 : vector<1x32xf32>
    %65 = arith.mulf %60, %62 : vector<1x32xf32>
    %66 = arith.addf %64, %65 : vector<1x32xf32>
    %67 = math.tanh %66 : vector<1x32xf32>
    %68 = arith.mulf %63, %67 : vector<1x32xf32>
    %69 = arith.truncf %68 : vector<1x32xf32> to vector<1x32xbf16>
    %cst_36 = arith.constant dense<0.000000e+00> : vector<1x128xf32>
    %70 = tpu.matmul %69, %7, %cst_36 {dimension_numbers = #tpu.dot_dimension_numbers<[1], [0], [0], [1], [0, 0, 1, 1], [], []>} : vector<1x32xbf16>, vector<32x128xbf16>, vector<1x128xf32> -> vector<1x128xf32>
    %71 = vector.extract_strided_slice %24 {offsets = [1, 0], sizes = [1, 128], strides = [1, 1]} : vector<8x128xf32> to vector<1x128xf32>
    %72 = arith.truncf %49 : vector<1x32xf32> to vector<1x32xbf16>
    %cst_37 = arith.constant dense<0.000000e+00> : vector<1x128xf32>
    %73 = tpu.matmul %72, %3, %cst_37 {dimension_numbers = #tpu.dot_dimension_numbers<[1], [0], [0], [1], [0, 0, 1, 1], [], []>} : vector<1x32xbf16>, vector<32x128xbf16>, vector<1x128xf32> -> vector<1x128xf32>
    %74 = arith.addf %71, %73 : vector<1x128xf32>
    %75 = arith.negf %74 : vector<1x128xf32>
    %76 = math.exp %75 : vector<1x128xf32>
    %cst_38 = arith.constant 1.000000e+00 : f32
    %77 = vector.broadcast %cst_38 : f32 to vector<1x128xf32>
    %78 = arith.addf %77, %76 : vector<1x128xf32>
    %79 = arith.divf %77, %78 : vector<1x128xf32>
    %80 = math.tanh %74 : vector<1x128xf32>
    %81 = vector.extract_strided_slice %79 {offsets = [0, 0], sizes = [1, 32], strides = [1, 1]} : vector<1x128xf32> to vector<1x32xf32>
    %82 = vector.extract_strided_slice %79 {offsets = [0, 32], sizes = [1, 32], strides = [1, 1]} : vector<1x128xf32> to vector<1x32xf32>
    %83 = vector.extract_strided_slice %80 {offsets = [0, 64], sizes = [1, 32], strides = [1, 1]} : vector<1x128xf32> to vector<1x32xf32>
    %84 = vector.extract_strided_slice %79 {offsets = [0, 96], sizes = [1, 32], strides = [1, 1]} : vector<1x128xf32> to vector<1x32xf32>
    %85 = arith.mulf %82, %47 : vector<1x32xf32>
    %86 = arith.mulf %81, %83 : vector<1x32xf32>
    %87 = arith.addf %85, %86 : vector<1x32xf32>
    %88 = math.tanh %87 : vector<1x32xf32>
    %89 = arith.mulf %84, %88 : vector<1x32xf32>
    %90 = arith.truncf %89 : vector<1x32xf32> to vector<1x32xbf16>
    %cst_39 = arith.constant dense<0.000000e+00> : vector<1x128xf32>
    %91 = tpu.matmul %90, %5, %cst_39 {dimension_numbers = #tpu.dot_dimension_numbers<[1], [0], [0], [1], [0, 0, 1, 1], [], []>} : vector<1x32xbf16>, vector<32x128xbf16>, vector<1x128xf32> -> vector<1x128xf32>
    %92 = arith.addf %91, %70 : vector<1x128xf32>
    %93 = arith.addf %92, %13 : vector<1x128xf32>
    %94 = arith.negf %93 : vector<1x128xf32>
    %95 = math.exp %94 : vector<1x128xf32>
    %cst_40 = arith.constant 1.000000e+00 : f32
    %96 = vector.broadcast %cst_40 : f32 to vector<1x128xf32>
    %97 = arith.addf %96, %95 : vector<1x128xf32>
    %98 = arith.divf %96, %97 : vector<1x128xf32>
    %99 = math.tanh %93 : vector<1x128xf32>
    %100 = vector.extract_strided_slice %98 {offsets = [0, 0], sizes = [1, 32], strides = [1, 1]} : vector<1x128xf32> to vector<1x32xf32>
    %101 = vector.extract_strided_slice %98 {offsets = [0, 32], sizes = [1, 32], strides = [1, 1]} : vector<1x128xf32> to vector<1x32xf32>
    %102 = vector.extract_strided_slice %99 {offsets = [0, 64], sizes = [1, 32], strides = [1, 1]} : vector<1x128xf32> to vector<1x32xf32>
    %103 = vector.extract_strided_slice %98 {offsets = [0, 96], sizes = [1, 32], strides = [1, 1]} : vector<1x128xf32> to vector<1x32xf32>
    %104 = arith.mulf %101, %66 : vector<1x32xf32>
    %105 = arith.mulf %100, %102 : vector<1x32xf32>
    %106 = arith.addf %104, %105 : vector<1x32xf32>
    %107 = math.tanh %106 : vector<1x32xf32>
    %108 = arith.mulf %103, %107 : vector<1x32xf32>
    %109 = arith.truncf %108 : vector<1x32xf32> to vector<1x32xbf16>
    %cst_41 = arith.constant dense<0.000000e+00> : vector<1x128xf32>
    %110 = tpu.matmul %109, %7, %cst_41 {dimension_numbers = #tpu.dot_dimension_numbers<[1], [0], [0], [1], [0, 0, 1, 1], [], []>} : vector<1x32xbf16>, vector<32x128xbf16>, vector<1x128xf32> -> vector<1x128xf32>
    %111 = vector.extract_strided_slice %24 {offsets = [2, 0], sizes = [1, 128], strides = [1, 1]} : vector<8x128xf32> to vector<1x128xf32>
    %112 = arith.truncf %89 : vector<1x32xf32> to vector<1x32xbf16>
    %cst_42 = arith.constant dense<0.000000e+00> : vector<1x128xf32>
    %113 = tpu.matmul %112, %3, %cst_42 {dimension_numbers = #tpu.dot_dimension_numbers<[1], [0], [0], [1], [0, 0, 1, 1], [], []>} : vector<1x32xbf16>, vector<32x128xbf16>, vector<1x128xf32> -> vector<1x128xf32>
    %114 = arith.addf %111, %113 : vector<1x128xf32>
    %115 = arith.negf %114 : vector<1x128xf32>
    %116 = math.exp %115 : vector<1x128xf32>
    %cst_43 = arith.constant 1.000000e+00 : f32
    %117 = vector.broadcast %cst_43 : f32 to vector<1x128xf32>
    %118 = arith.addf %117, %116 : vector<1x128xf32>
    %119 = arith.divf %117, %118 : vector<1x128xf32>
    %120 = math.tanh %114 : vector<1x128xf32>
    %121 = vector.extract_strided_slice %119 {offsets = [0, 0], sizes = [1, 32], strides = [1, 1]} : vector<1x128xf32> to vector<1x32xf32>
    %122 = vector.extract_strided_slice %119 {offsets = [0, 32], sizes = [1, 32], strides = [1, 1]} : vector<1x128xf32> to vector<1x32xf32>
    %123 = vector.extract_strided_slice %120 {offsets = [0, 64], sizes = [1, 32], strides = [1, 1]} : vector<1x128xf32> to vector<1x32xf32>
    %124 = vector.extract_strided_slice %119 {offsets = [0, 96], sizes = [1, 32], strides = [1, 1]} : vector<1x128xf32> to vector<1x32xf32>
    %125 = arith.mulf %122, %87 : vector<1x32xf32>
    %126 = arith.mulf %121, %123 : vector<1x32xf32>
    %127 = arith.addf %125, %126 : vector<1x32xf32>
    %128 = math.tanh %127 : vector<1x32xf32>
    %129 = arith.mulf %124, %128 : vector<1x32xf32>
    %130 = arith.truncf %129 : vector<1x32xf32> to vector<1x32xbf16>
    %cst_44 = arith.constant dense<0.000000e+00> : vector<1x128xf32>
    %131 = tpu.matmul %130, %5, %cst_44 {dimension_numbers = #tpu.dot_dimension_numbers<[1], [0], [0], [1], [0, 0, 1, 1], [], []>} : vector<1x32xbf16>, vector<32x128xbf16>, vector<1x128xf32> -> vector<1x128xf32>
    %132 = arith.addf %131, %110 : vector<1x128xf32>
    %133 = arith.addf %132, %13 : vector<1x128xf32>
    %134 = arith.negf %133 : vector<1x128xf32>
    %135 = math.exp %134 : vector<1x128xf32>
    %cst_45 = arith.constant 1.000000e+00 : f32
    %136 = vector.broadcast %cst_45 : f32 to vector<1x128xf32>
    %137 = arith.addf %136, %135 : vector<1x128xf32>
    %138 = arith.divf %136, %137 : vector<1x128xf32>
    %139 = math.tanh %133 : vector<1x128xf32>
    %140 = vector.extract_strided_slice %138 {offsets = [0, 0], sizes = [1, 32], strides = [1, 1]} : vector<1x128xf32> to vector<1x32xf32>
    %141 = vector.extract_strided_slice %138 {offsets = [0, 32], sizes = [1, 32], strides = [1, 1]} : vector<1x128xf32> to vector<1x32xf32>
    %142 = vector.extract_strided_slice %139 {offsets = [0, 64], sizes = [1, 32], strides = [1, 1]} : vector<1x128xf32> to vector<1x32xf32>
    %143 = vector.extract_strided_slice %138 {offsets = [0, 96], sizes = [1, 32], strides = [1, 1]} : vector<1x128xf32> to vector<1x32xf32>
    %144 = arith.mulf %141, %106 : vector<1x32xf32>
    %145 = arith.mulf %140, %142 : vector<1x32xf32>
    %146 = arith.addf %144, %145 : vector<1x32xf32>
    %147 = math.tanh %146 : vector<1x32xf32>
    %148 = arith.mulf %143, %147 : vector<1x32xf32>
    %149 = arith.truncf %148 : vector<1x32xf32> to vector<1x32xbf16>
    %cst_46 = arith.constant dense<0.000000e+00> : vector<1x128xf32>
    %150 = tpu.matmul %149, %7, %cst_46 {dimension_numbers = #tpu.dot_dimension_numbers<[1], [0], [0], [1], [0, 0, 1, 1], [], []>} : vector<1x32xbf16>, vector<32x128xbf16>, vector<1x128xf32> -> vector<1x128xf32>
    %151 = vector.extract_strided_slice %24 {offsets = [3, 0], sizes = [1, 128], strides = [1, 1]} : vector<8x128xf32> to vector<1x128xf32>
    %152 = arith.truncf %129 : vector<1x32xf32> to vector<1x32xbf16>
    %cst_47 = arith.constant dense<0.000000e+00> : vector<1x128xf32>
    %153 = tpu.matmul %152, %3, %cst_47 {dimension_numbers = #tpu.dot_dimension_numbers<[1], [0], [0], [1], [0, 0, 1, 1], [], []>} : vector<1x32xbf16>, vector<32x128xbf16>, vector<1x128xf32> -> vector<1x128xf32>
    %154 = arith.addf %151, %153 : vector<1x128xf32>
    %155 = arith.negf %154 : vector<1x128xf32>
    %156 = math.exp %155 : vector<1x128xf32>
    %cst_48 = arith.constant 1.000000e+00 : f32
    %157 = vector.broadcast %cst_48 : f32 to vector<1x128xf32>
    %158 = arith.addf %157, %156 : vector<1x128xf32>
    %159 = arith.divf %157, %158 : vector<1x128xf32>
    %160 = math.tanh %154 : vector<1x128xf32>
    %161 = vector.extract_strided_slice %159 {offsets = [0, 0], sizes = [1, 32], strides = [1, 1]} : vector<1x128xf32> to vector<1x32xf32>
    %162 = vector.extract_strided_slice %159 {offsets = [0, 32], sizes = [1, 32], strides = [1, 1]} : vector<1x128xf32> to vector<1x32xf32>
    %163 = vector.extract_strided_slice %160 {offsets = [0, 64], sizes = [1, 32], strides = [1, 1]} : vector<1x128xf32> to vector<1x32xf32>
    %164 = vector.extract_strided_slice %159 {offsets = [0, 96], sizes = [1, 32], strides = [1, 1]} : vector<1x128xf32> to vector<1x32xf32>
    %165 = arith.mulf %162, %127 : vector<1x32xf32>
    %166 = arith.mulf %161, %163 : vector<1x32xf32>
    %167 = arith.addf %165, %166 : vector<1x32xf32>
    %168 = math.tanh %167 : vector<1x32xf32>
    %169 = arith.mulf %164, %168 : vector<1x32xf32>
    %170 = arith.truncf %169 : vector<1x32xf32> to vector<1x32xbf16>
    %cst_49 = arith.constant dense<0.000000e+00> : vector<1x128xf32>
    %171 = tpu.matmul %170, %5, %cst_49 {dimension_numbers = #tpu.dot_dimension_numbers<[1], [0], [0], [1], [0, 0, 1, 1], [], []>} : vector<1x32xbf16>, vector<32x128xbf16>, vector<1x128xf32> -> vector<1x128xf32>
    %172 = arith.addf %171, %150 : vector<1x128xf32>
    %173 = arith.addf %172, %13 : vector<1x128xf32>
    %174 = arith.negf %173 : vector<1x128xf32>
    %175 = math.exp %174 : vector<1x128xf32>
    %cst_50 = arith.constant 1.000000e+00 : f32
    %176 = vector.broadcast %cst_50 : f32 to vector<1x128xf32>
    %177 = arith.addf %176, %175 : vector<1x128xf32>
    %178 = arith.divf %176, %177 : vector<1x128xf32>
    %179 = math.tanh %173 : vector<1x128xf32>
    %180 = vector.extract_strided_slice %178 {offsets = [0, 0], sizes = [1, 32], strides = [1, 1]} : vector<1x128xf32> to vector<1x32xf32>
    %181 = vector.extract_strided_slice %178 {offsets = [0, 32], sizes = [1, 32], strides = [1, 1]} : vector<1x128xf32> to vector<1x32xf32>
    %182 = vector.extract_strided_slice %179 {offsets = [0, 64], sizes = [1, 32], strides = [1, 1]} : vector<1x128xf32> to vector<1x32xf32>
    %183 = vector.extract_strided_slice %178 {offsets = [0, 96], sizes = [1, 32], strides = [1, 1]} : vector<1x128xf32> to vector<1x32xf32>
    %184 = arith.mulf %181, %146 : vector<1x32xf32>
    %185 = arith.mulf %180, %182 : vector<1x32xf32>
    %186 = arith.addf %184, %185 : vector<1x32xf32>
    %187 = math.tanh %186 : vector<1x32xf32>
    %188 = arith.mulf %183, %187 : vector<1x32xf32>
    %189 = arith.truncf %188 : vector<1x32xf32> to vector<1x32xbf16>
    %cst_51 = arith.constant dense<0.000000e+00> : vector<1x128xf32>
    %190 = tpu.matmul %189, %7, %cst_51 {dimension_numbers = #tpu.dot_dimension_numbers<[1], [0], [0], [1], [0, 0, 1, 1], [], []>} : vector<1x32xbf16>, vector<32x128xbf16>, vector<1x128xf32> -> vector<1x128xf32>
    %191 = vector.extract_strided_slice %24 {offsets = [4, 0], sizes = [1, 128], strides = [1, 1]} : vector<8x128xf32> to vector<1x128xf32>
    %192 = arith.truncf %169 : vector<1x32xf32> to vector<1x32xbf16>
    %cst_52 = arith.constant dense<0.000000e+00> : vector<1x128xf32>
    %193 = tpu.matmul %192, %3, %cst_52 {dimension_numbers = #tpu.dot_dimension_numbers<[1], [0], [0], [1], [0, 0, 1, 1], [], []>} : vector<1x32xbf16>, vector<32x128xbf16>, vector<1x128xf32> -> vector<1x128xf32>
    %194 = arith.addf %191, %193 : vector<1x128xf32>
    %195 = arith.negf %194 : vector<1x128xf32>
    %196 = math.exp %195 : vector<1x128xf32>
    %cst_53 = arith.constant 1.000000e+00 : f32
    %197 = vector.broadcast %cst_53 : f32 to vector<1x128xf32>
    %198 = arith.addf %197, %196 : vector<1x128xf32>
    %199 = arith.divf %197, %198 : vector<1x128xf32>
    %200 = math.tanh %194 : vector<1x128xf32>
    %201 = vector.extract_strided_slice %199 {offsets = [0, 0], sizes = [1, 32], strides = [1, 1]} : vector<1x128xf32> to vector<1x32xf32>
    %202 = vector.extract_strided_slice %199 {offsets = [0, 32], sizes = [1, 32], strides = [1, 1]} : vector<1x128xf32> to vector<1x32xf32>
    %203 = vector.extract_strided_slice %200 {offsets = [0, 64], sizes = [1, 32], strides = [1, 1]} : vector<1x128xf32> to vector<1x32xf32>
    %204 = vector.extract_strided_slice %199 {offsets = [0, 96], sizes = [1, 32], strides = [1, 1]} : vector<1x128xf32> to vector<1x32xf32>
    %205 = arith.mulf %202, %167 : vector<1x32xf32>
    %206 = arith.mulf %201, %203 : vector<1x32xf32>
    %207 = arith.addf %205, %206 : vector<1x32xf32>
    %208 = math.tanh %207 : vector<1x32xf32>
    %209 = arith.mulf %204, %208 : vector<1x32xf32>
    %210 = arith.truncf %209 : vector<1x32xf32> to vector<1x32xbf16>
    %cst_54 = arith.constant dense<0.000000e+00> : vector<1x128xf32>
    %211 = tpu.matmul %210, %5, %cst_54 {dimension_numbers = #tpu.dot_dimension_numbers<[1], [0], [0], [1], [0, 0, 1, 1], [], []>} : vector<1x32xbf16>, vector<32x128xbf16>, vector<1x128xf32> -> vector<1x128xf32>
    %212 = arith.addf %211, %190 : vector<1x128xf32>
    %213 = arith.addf %212, %13 : vector<1x128xf32>
    %214 = arith.negf %213 : vector<1x128xf32>
    %215 = math.exp %214 : vector<1x128xf32>
    %cst_55 = arith.constant 1.000000e+00 : f32
    %216 = vector.broadcast %cst_55 : f32 to vector<1x128xf32>
    %217 = arith.addf %216, %215 : vector<1x128xf32>
    %218 = arith.divf %216, %217 : vector<1x128xf32>
    %219 = math.tanh %213 : vector<1x128xf32>
    %220 = vector.extract_strided_slice %218 {offsets = [0, 0], sizes = [1, 32], strides = [1, 1]} : vector<1x128xf32> to vector<1x32xf32>
    %221 = vector.extract_strided_slice %218 {offsets = [0, 32], sizes = [1, 32], strides = [1, 1]} : vector<1x128xf32> to vector<1x32xf32>
    %222 = vector.extract_strided_slice %219 {offsets = [0, 64], sizes = [1, 32], strides = [1, 1]} : vector<1x128xf32> to vector<1x32xf32>
    %223 = vector.extract_strided_slice %218 {offsets = [0, 96], sizes = [1, 32], strides = [1, 1]} : vector<1x128xf32> to vector<1x32xf32>
    %224 = arith.mulf %221, %186 : vector<1x32xf32>
    %225 = arith.mulf %220, %222 : vector<1x32xf32>
    %226 = arith.addf %224, %225 : vector<1x32xf32>
    %227 = math.tanh %226 : vector<1x32xf32>
    %228 = arith.mulf %223, %227 : vector<1x32xf32>
    %229 = arith.truncf %228 : vector<1x32xf32> to vector<1x32xbf16>
    %cst_56 = arith.constant dense<0.000000e+00> : vector<1x128xf32>
    %230 = tpu.matmul %229, %7, %cst_56 {dimension_numbers = #tpu.dot_dimension_numbers<[1], [0], [0], [1], [0, 0, 1, 1], [], []>} : vector<1x32xbf16>, vector<32x128xbf16>, vector<1x128xf32> -> vector<1x128xf32>
    %231 = vector.extract_strided_slice %24 {offsets = [5, 0], sizes = [1, 128], strides = [1, 1]} : vector<8x128xf32> to vector<1x128xf32>
    %232 = arith.truncf %209 : vector<1x32xf32> to vector<1x32xbf16>
    %cst_57 = arith.constant dense<0.000000e+00> : vector<1x128xf32>
    %233 = tpu.matmul %232, %3, %cst_57 {dimension_numbers = #tpu.dot_dimension_numbers<[1], [0], [0], [1], [0, 0, 1, 1], [], []>} : vector<1x32xbf16>, vector<32x128xbf16>, vector<1x128xf32> -> vector<1x128xf32>
    %234 = arith.addf %231, %233 : vector<1x128xf32>
    %235 = arith.negf %234 : vector<1x128xf32>
    %236 = math.exp %235 : vector<1x128xf32>
    %cst_58 = arith.constant 1.000000e+00 : f32
    %237 = vector.broadcast %cst_58 : f32 to vector<1x128xf32>
    %238 = arith.addf %237, %236 : vector<1x128xf32>
    %239 = arith.divf %237, %238 : vector<1x128xf32>
    %240 = math.tanh %234 : vector<1x128xf32>
    %241 = vector.extract_strided_slice %239 {offsets = [0, 0], sizes = [1, 32], strides = [1, 1]} : vector<1x128xf32> to vector<1x32xf32>
    %242 = vector.extract_strided_slice %239 {offsets = [0, 32], sizes = [1, 32], strides = [1, 1]} : vector<1x128xf32> to vector<1x32xf32>
    %243 = vector.extract_strided_slice %240 {offsets = [0, 64], sizes = [1, 32], strides = [1, 1]} : vector<1x128xf32> to vector<1x32xf32>
    %244 = vector.extract_strided_slice %239 {offsets = [0, 96], sizes = [1, 32], strides = [1, 1]} : vector<1x128xf32> to vector<1x32xf32>
    %245 = arith.mulf %242, %207 : vector<1x32xf32>
    %246 = arith.mulf %241, %243 : vector<1x32xf32>
    %247 = arith.addf %245, %246 : vector<1x32xf32>
    %248 = math.tanh %247 : vector<1x32xf32>
    %249 = arith.mulf %244, %248 : vector<1x32xf32>
    %250 = arith.truncf %249 : vector<1x32xf32> to vector<1x32xbf16>
    %cst_59 = arith.constant dense<0.000000e+00> : vector<1x128xf32>
    %251 = tpu.matmul %250, %5, %cst_59 {dimension_numbers = #tpu.dot_dimension_numbers<[1], [0], [0], [1], [0, 0, 1, 1], [], []>} : vector<1x32xbf16>, vector<32x128xbf16>, vector<1x128xf32> -> vector<1x128xf32>
    %252 = arith.addf %251, %230 : vector<1x128xf32>
    %253 = arith.addf %252, %13 : vector<1x128xf32>
    %254 = arith.negf %253 : vector<1x128xf32>
    %255 = math.exp %254 : vector<1x128xf32>
    %cst_60 = arith.constant 1.000000e+00 : f32
    %256 = vector.broadcast %cst_60 : f32 to vector<1x128xf32>
    %257 = arith.addf %256, %255 : vector<1x128xf32>
    %258 = arith.divf %256, %257 : vector<1x128xf32>
    %259 = math.tanh %253 : vector<1x128xf32>
    %260 = vector.extract_strided_slice %258 {offsets = [0, 0], sizes = [1, 32], strides = [1, 1]} : vector<1x128xf32> to vector<1x32xf32>
    %261 = vector.extract_strided_slice %258 {offsets = [0, 32], sizes = [1, 32], strides = [1, 1]} : vector<1x128xf32> to vector<1x32xf32>
    %262 = vector.extract_strided_slice %259 {offsets = [0, 64], sizes = [1, 32], strides = [1, 1]} : vector<1x128xf32> to vector<1x32xf32>
    %263 = vector.extract_strided_slice %258 {offsets = [0, 96], sizes = [1, 32], strides = [1, 1]} : vector<1x128xf32> to vector<1x32xf32>
    %264 = arith.mulf %261, %226 : vector<1x32xf32>
    %265 = arith.mulf %260, %262 : vector<1x32xf32>
    %266 = arith.addf %264, %265 : vector<1x32xf32>
    %267 = math.tanh %266 : vector<1x32xf32>
    %268 = arith.mulf %263, %267 : vector<1x32xf32>
    %269 = arith.truncf %268 : vector<1x32xf32> to vector<1x32xbf16>
    %cst_61 = arith.constant dense<0.000000e+00> : vector<1x128xf32>
    %270 = tpu.matmul %269, %7, %cst_61 {dimension_numbers = #tpu.dot_dimension_numbers<[1], [0], [0], [1], [0, 0, 1, 1], [], []>} : vector<1x32xbf16>, vector<32x128xbf16>, vector<1x128xf32> -> vector<1x128xf32>
    %271 = vector.extract_strided_slice %24 {offsets = [6, 0], sizes = [1, 128], strides = [1, 1]} : vector<8x128xf32> to vector<1x128xf32>
    %272 = arith.truncf %249 : vector<1x32xf32> to vector<1x32xbf16>
    %cst_62 = arith.constant dense<0.000000e+00> : vector<1x128xf32>
    %273 = tpu.matmul %272, %3, %cst_62 {dimension_numbers = #tpu.dot_dimension_numbers<[1], [0], [0], [1], [0, 0, 1, 1], [], []>} : vector<1x32xbf16>, vector<32x128xbf16>, vector<1x128xf32> -> vector<1x128xf32>
    %274 = arith.addf %271, %273 : vector<1x128xf32>
    %275 = arith.negf %274 : vector<1x128xf32>
    %276 = math.exp %275 : vector<1x128xf32>
    %cst_63 = arith.constant 1.000000e+00 : f32
    %277 = vector.broadcast %cst_63 : f32 to vector<1x128xf32>
    %278 = arith.addf %277, %276 : vector<1x128xf32>
    %279 = arith.divf %277, %278 : vector<1x128xf32>
    %280 = math.tanh %274 : vector<1x128xf32>
    %281 = vector.extract_strided_slice %279 {offsets = [0, 0], sizes = [1, 32], strides = [1, 1]} : vector<1x128xf32> to vector<1x32xf32>
    %282 = vector.extract_strided_slice %279 {offsets = [0, 32], sizes = [1, 32], strides = [1, 1]} : vector<1x128xf32> to vector<1x32xf32>
    %283 = vector.extract_strided_slice %280 {offsets = [0, 64], sizes = [1, 32], strides = [1, 1]} : vector<1x128xf32> to vector<1x32xf32>
    %284 = vector.extract_strided_slice %279 {offsets = [0, 96], sizes = [1, 32], strides = [1, 1]} : vector<1x128xf32> to vector<1x32xf32>
    %285 = arith.mulf %282, %247 : vector<1x32xf32>
    %286 = arith.mulf %281, %283 : vector<1x32xf32>
    %287 = arith.addf %285, %286 : vector<1x32xf32>
    %288 = math.tanh %287 : vector<1x32xf32>
    %289 = arith.mulf %284, %288 : vector<1x32xf32>
    %290 = arith.truncf %289 : vector<1x32xf32> to vector<1x32xbf16>
    %cst_64 = arith.constant dense<0.000000e+00> : vector<1x128xf32>
    %291 = tpu.matmul %290, %5, %cst_64 {dimension_numbers = #tpu.dot_dimension_numbers<[1], [0], [0], [1], [0, 0, 1, 1], [], []>} : vector<1x32xbf16>, vector<32x128xbf16>, vector<1x128xf32> -> vector<1x128xf32>
    %292 = arith.addf %291, %270 : vector<1x128xf32>
    %293 = arith.addf %292, %13 : vector<1x128xf32>
    %294 = arith.negf %293 : vector<1x128xf32>
    %295 = math.exp %294 : vector<1x128xf32>
    %cst_65 = arith.constant 1.000000e+00 : f32
    %296 = vector.broadcast %cst_65 : f32 to vector<1x128xf32>
    %297 = arith.addf %296, %295 : vector<1x128xf32>
    %298 = arith.divf %296, %297 : vector<1x128xf32>
    %299 = math.tanh %293 : vector<1x128xf32>
    %300 = vector.extract_strided_slice %298 {offsets = [0, 0], sizes = [1, 32], strides = [1, 1]} : vector<1x128xf32> to vector<1x32xf32>
    %301 = vector.extract_strided_slice %298 {offsets = [0, 32], sizes = [1, 32], strides = [1, 1]} : vector<1x128xf32> to vector<1x32xf32>
    %302 = vector.extract_strided_slice %299 {offsets = [0, 64], sizes = [1, 32], strides = [1, 1]} : vector<1x128xf32> to vector<1x32xf32>
    %303 = vector.extract_strided_slice %298 {offsets = [0, 96], sizes = [1, 32], strides = [1, 1]} : vector<1x128xf32> to vector<1x32xf32>
    %304 = arith.mulf %301, %266 : vector<1x32xf32>
    %305 = arith.mulf %300, %302 : vector<1x32xf32>
    %306 = arith.addf %304, %305 : vector<1x32xf32>
    %307 = math.tanh %306 : vector<1x32xf32>
    %308 = arith.mulf %303, %307 : vector<1x32xf32>
    %309 = arith.truncf %308 : vector<1x32xf32> to vector<1x32xbf16>
    %cst_66 = arith.constant dense<0.000000e+00> : vector<1x128xf32>
    %310 = tpu.matmul %309, %7, %cst_66 {dimension_numbers = #tpu.dot_dimension_numbers<[1], [0], [0], [1], [0, 0, 1, 1], [], []>} : vector<1x32xbf16>, vector<32x128xbf16>, vector<1x128xf32> -> vector<1x128xf32>
    %311 = vector.extract_strided_slice %24 {offsets = [7, 0], sizes = [1, 128], strides = [1, 1]} : vector<8x128xf32> to vector<1x128xf32>
    %312 = arith.truncf %289 : vector<1x32xf32> to vector<1x32xbf16>
    %cst_67 = arith.constant dense<0.000000e+00> : vector<1x128xf32>
    %313 = tpu.matmul %312, %3, %cst_67 {dimension_numbers = #tpu.dot_dimension_numbers<[1], [0], [0], [1], [0, 0, 1, 1], [], []>} : vector<1x32xbf16>, vector<32x128xbf16>, vector<1x128xf32> -> vector<1x128xf32>
    %314 = arith.addf %311, %313 : vector<1x128xf32>
    %315 = arith.negf %314 : vector<1x128xf32>
    %316 = math.exp %315 : vector<1x128xf32>
    %cst_68 = arith.constant 1.000000e+00 : f32
    %317 = vector.broadcast %cst_68 : f32 to vector<1x128xf32>
    %318 = arith.addf %317, %316 : vector<1x128xf32>
    %319 = arith.divf %317, %318 : vector<1x128xf32>
    %320 = math.tanh %314 : vector<1x128xf32>
    %321 = vector.extract_strided_slice %319 {offsets = [0, 0], sizes = [1, 32], strides = [1, 1]} : vector<1x128xf32> to vector<1x32xf32>
    %322 = vector.extract_strided_slice %319 {offsets = [0, 32], sizes = [1, 32], strides = [1, 1]} : vector<1x128xf32> to vector<1x32xf32>
    %323 = vector.extract_strided_slice %320 {offsets = [0, 64], sizes = [1, 32], strides = [1, 1]} : vector<1x128xf32> to vector<1x32xf32>
    %324 = vector.extract_strided_slice %319 {offsets = [0, 96], sizes = [1, 32], strides = [1, 1]} : vector<1x128xf32> to vector<1x32xf32>
    %325 = arith.mulf %322, %287 : vector<1x32xf32>
    %326 = arith.mulf %321, %323 : vector<1x32xf32>
    %327 = arith.addf %325, %326 : vector<1x32xf32>
    %328 = math.tanh %327 : vector<1x32xf32>
    %329 = arith.mulf %324, %328 : vector<1x32xf32>
    %330 = arith.truncf %329 : vector<1x32xf32> to vector<1x32xbf16>
    %cst_69 = arith.constant dense<0.000000e+00> : vector<1x128xf32>
    %331 = tpu.matmul %330, %5, %cst_69 {dimension_numbers = #tpu.dot_dimension_numbers<[1], [0], [0], [1], [0, 0, 1, 1], [], []>} : vector<1x32xbf16>, vector<32x128xbf16>, vector<1x128xf32> -> vector<1x128xf32>
    %332 = arith.addf %331, %310 : vector<1x128xf32>
    %333 = arith.addf %332, %13 : vector<1x128xf32>
    %334 = arith.negf %333 : vector<1x128xf32>
    %335 = math.exp %334 : vector<1x128xf32>
    %cst_70 = arith.constant 1.000000e+00 : f32
    %336 = vector.broadcast %cst_70 : f32 to vector<1x128xf32>
    %337 = arith.addf %336, %335 : vector<1x128xf32>
    %338 = arith.divf %336, %337 : vector<1x128xf32>
    %339 = math.tanh %333 : vector<1x128xf32>
    %340 = vector.extract_strided_slice %338 {offsets = [0, 0], sizes = [1, 32], strides = [1, 1]} : vector<1x128xf32> to vector<1x32xf32>
    %341 = vector.extract_strided_slice %338 {offsets = [0, 32], sizes = [1, 32], strides = [1, 1]} : vector<1x128xf32> to vector<1x32xf32>
    %342 = vector.extract_strided_slice %339 {offsets = [0, 64], sizes = [1, 32], strides = [1, 1]} : vector<1x128xf32> to vector<1x32xf32>
    %343 = vector.extract_strided_slice %338 {offsets = [0, 96], sizes = [1, 32], strides = [1, 1]} : vector<1x128xf32> to vector<1x32xf32>
    %344 = arith.mulf %341, %306 : vector<1x32xf32>
    %345 = arith.mulf %340, %342 : vector<1x32xf32>
    %346 = arith.addf %344, %345 : vector<1x32xf32>
    %347 = math.tanh %346 : vector<1x32xf32>
    %348 = arith.mulf %343, %347 : vector<1x32xf32>
    %349 = tpu.concatenate %329, %348, %327, %346 in 0 : vector<1x32xf32>, vector<1x32xf32>, vector<1x32xf32>, vector<1x32xf32> -> vector<4x32xf32>
    %350 = vector.extract_strided_slice %349 {offsets = [0, 0], sizes = [2, 32], strides = [1, 1]} : vector<4x32xf32> to vector<2x32xf32>
    %351 = vector.broadcast %14 : vector<1x32xf32> to vector<2x32xf32>
    %352 = arith.mulf %350, %351 : vector<2x32xf32>
    %cst_71 = arith.constant dense<0.000000e+00> : vector<2xf32>
    %353 = vector.multi_reduction <add>, %352, %cst_71 [1] : vector<2x32xf32> to vector<2xf32>
    %354 = vector.shape_cast %353 : vector<2xf32> to vector<2x1xf32>
    %355 = vector.broadcast %15 : vector<1x1xf32> to vector<2x1xf32>
    %356 = arith.addf %354, %355 : vector<2x1xf32>
    %cst_72 = arith.constant 0.000000e+00 : f32
    %357 = vector.broadcast %cst_72 : f32 to vector<2x31xf32>
    %358 = tpu.concatenate %356, %357 in 1 : vector<2x1xf32>, vector<2x31xf32> -> vector<2x32xf32>
    %cst_73 = arith.constant 0.000000e+00 : f32
    %359 = vector.broadcast %cst_73 : f32 to vector<2x32xf32>
    %360 = tpu.concatenate %349, %358, %359 in 0 : vector<4x32xf32>, vector<2x32xf32>, vector<2x32xf32> -> vector<8x32xf32>
    %cst_74 = arith.constant 0.000000e+00 : f32
    %361 = vector.broadcast %cst_74 : f32 to vector<8x96xf32>
    %362 = tpu.concatenate %360, %361 in 1 : vector<8x32xf32>, vector<8x96xf32> -> vector<8x128xf32>
    %c0_75 = arith.constant 0 : index
    %c0_76 = arith.constant 0 : index
    %363 = vector.load %arg4[%c0_75, %c0_76] : memref<8x128xf32, #tpu.memory_space<vmem>>, vector<8x128xf32>
    tpu.vector_store %arg4[%c0_75, %c0_76], %362 {strides = array<i32>} : memref<8x128xf32, #tpu.memory_space<vmem>>, vector<8x128xf32>,
    return
  }
}

</mosaic_0001>

<bundles_post_ra>
// kernel: tpu_custom_call.1
= control target key start
LH: loop header
LB: loop body
LE: loop exit
PB: predicated region body
PF: predicated region fallthrough
CT: control target
= control target key end

     0   :  { %9 = vsyncpa [#allocation3], 0  ;;  %s2860_s0 = inlined_call_operand.hbm [shape: f32[8,32], index: 0, kind: input, shape index: {}]   ;;  %s2861_s1 = inlined_call_operand.hbm [shape: f32[4,32], index: 1, kind: input, shape index: {}]   ;;  %s2862_s2 = inlined_call_operand.hbm [shape: bf16[5,32,128], index: 2, kind: input, shape index: {}]   ;;  %s2863_s3 = inlined_call_operand.hbm [shape: f32[8,128], index: 3, kind: input, shape index: {}]   ;;  %s2864_s4 = inlined_call_operand.hbm [shape: f32[8,128], index: 4, kind: output, shape index: {}]  }
   0x1   :  { %10 = vsyncpa [#allocation6], 0 }
   0x2   :  { %11 = vsyncpa [#allocation9], 0 }
   0x3   :  { %12 = vsyncpa [#allocation4], 0  ;;  %s2478_s15 = smov [#allocation5]   ;;  %s2479_s17 = smov [#allocation2]  }
   0x4   :  { %s29_s16 = sshll.u32 %s2478_s15, 4  ;;  %s19_s18 = sshll.u32 %s2479_s17, 4  ;;  %s30_s16 = int_to_ptr.vmem [resolvable:$true] %s29_s16  ;;  %s20_s18 = int_to_ptr.vmem [resolvable:$true] %s19_s18 }
   0x5   :  { %s2378_s19 = scalar_lea.vmem %s30_s16, 64  ;;  %p2383_p1 = scmp.lt.s32.totalorder %s30_s16, %s30_s16 }
   0x6   :  { %p2379_p0 = scmp.ne.s32.totalorder %s30_s16, %s2378_s19  ;;  %p2384_p2 = scmp.lt.s32.totalorder %s2378_s19, %s2378_s19 }
   0x8   :  { %p2385_p3 = por %p2384_p2, %p2383_p1 }
   0xa   :  { %p2386_p4 = pnand %p2385_p3, %p2379_p0 }
   0xc   :  { %2389 = shalt.err (!%p2386_p4)
}
   0xd   :  { %32 = dma.hbm_to_vmem [thread:$0]  %s2861_s1, 64, %s30_s16, [#allocation6]  }
   0xe   :  { %s2398_s22 = scalar_lea.vmem %s20_s18, 128  ;;  %p2403_p6 = scmp.lt.s32.totalorder %s20_s18, %s20_s18 }
   0xf   :  { %p2399_p5 = scmp.ne.s32.totalorder %s20_s18, %s2398_s22  ;;  %p2404_p7 = scmp.lt.s32.totalorder %s2398_s22, %s2398_s22 }
  0x11   :  { %p2405_p8 = por %p2404_p7, %p2403_p6 }
  0x13   :  { %p2406_p9 = pnand %p2405_p8, %p2399_p5 }
  0x15   :  { %2409 = shalt.err (!%p2406_p9)
}
  0x16   :  { %22 = dma.hbm_to_vmem [thread:$0]  %s2860_s0, 128, %s20_s18, [#allocation3]  }
  0x17   :  { %s2480_s25 = smov [#allocation7]  }
  0x18   :  { %s38_s26 = sshll.u32 %s2480_s25, 4  ;;  %s39_s26 = int_to_ptr.vmem [resolvable:$true] %s38_s26 }
  0x19   :  { %s2418_s27 = scalar_lea.vmem %s39_s26, 1280  ;;  %p2423_p11 = scmp.lt.s32.totalorder %s39_s26, %s39_s26 }
  0x1a   :  { %p2419_p10 = scmp.ne.s32.totalorder %s39_s26, %s2418_s27  ;;  %p2424_p12 = scmp.lt.s32.totalorder %s2418_s27, %s2418_s27 }
  0x1c   :  { %p2425_p13 = por %p2424_p12, %p2423_p11 }
  0x1e   :  { %p2426_p0 = pnand %p2425_p13, %p2419_p10 }
  0x20   :  { %2429 = shalt.err (!%p2426_p0)
}
  0x21   :  { %s2481_s1 = smov 64   ;;  %s2482_s28 = smov 4  }
  0x22   :  { %44 = dma.hbm_to_vmem [thread:$0]  %s2862_s2, 1280, %s39_s26, [#allocation6], %s2481_s1, %s2481_s1, %s2482_s28  }
  0x23   :  { %s2483_s5 = smov [#allocation8]  }
  0x24   :  { %s51_s0 = sshll.u32 %s2483_s5, 4  ;;  %s52_s0 = int_to_ptr.vmem [resolvable:$true] %s51_s0 }
  0x25   :  { %s2438_s6 = scalar_lea.vmem %s52_s0, 128  ;;  %p2443_p2 = scmp.lt.s32.totalorder %s52_s0, %s52_s0 }
  0x26   :  { %p2439_p1 = scmp.ne.s32.totalorder %s52_s0, %s2438_s6  ;;  %p2444_p3 = scmp.lt.s32.totalorder %s2438_s6, %s2438_s6 }
  0x28   :  { %p2445_p4 = por %p2444_p3, %p2443_p2 }
  0x2a   :  { %p2446_p5 = pnand %p2445_p4, %p2439_p1 }
  0x2c   :  { %2449 = shalt.err (!%p2446_p5)
}
  0x2d   :  { %54 = dma.hbm_to_vmem [thread:$0]  %s2863_s3, 128, %s52_s0, [#allocation9]  }
  0x2e   :  { %2470 = dma.done.wait [#allocation3], 128  }
  0x2f   :  { %2471 = vsyncadd [#allocation3], 4294967168 }
  0x30   :  { %2472 = dma.done.wait [#allocation6], 1344  }
  0x31   :  { %2473 = vsyncadd [#allocation6], 4294965952 }
  0x32   :  { %2474 = dma.done.wait [#allocation9], 128  }
  0x33   :  { %2475 = vsyncadd [#allocation9], 4294967168  ;;  %v2484_v0 = vmov 0.0   ;;  %vm2485_vm0 = vmmov 0   ;;  %v2227_v1 = vld [vmem:[#allocation7 + $0x48] sm:$0xff]   ;;  %v2228_v2 = vld [vmem:[#allocation7 + $0x40] sm:$0xff]  }
  0x34   :  { %2008 = vmatprep.subr.bf16.mxu0 %v2484_v0  ;;  %2012 = vmatprep.mubr.msk.bf16.mxu0 %vm2485_vm0, %v2484_v0  ;;  %v97_v3 = vld [vmem:[#allocation2] sm:$0xff]  ;;  %vm115_vm1 = vcmask 261120   ;;  %v2229_v4 = vld [vmem:[#allocation7 + $0x8] sm:$0xff]   ;;  %v2230_v6 = vld [vmem:[#allocation7] sm:$0xff]   ;;  %s2486_s2 = smov 32   ;;  %s2487_s3 = smov 96  }
  0x35   :  { %2016 = vmatprep.subr.bf16.mxu1 %v2484_v0  ;;  %2020 = vmatprep.mubr.msk.bf16.mxu1 %vm2485_vm0, %v2484_v0  ;;  %v98_v5 = vpack.c.bf16 %v97_v3, %v97_v3  ;;  %v1874_v7 = vld [vmem:[#allocation8] ss:$0 sm:$0xff]  ;;  %v2541_v11 = vld [vmem:[#allocation7 + $0x18] sm:$0xff]   ;;  %v1878_v20 = vld [vmem:[#allocation8 + $0x1] ss:$0 sm:$0xff]  ;;  %vm1812_vm2 = vcmask 1040384  }
  0x36   :  { %2009 = vmatpush3.bf16.msra.mxu0 %v2227_v1  ;;  %2017 = vmatpush3.bf16.msra.mxu1 %v2229_v4  ;;  %v2545_v15 = vld [vmem:[#allocation7 + $0x10] sm:$0xff]   ;;  %v219_v16 = vld [vmem:[#allocation5] sm:$0x1]  ;;  %v221_v30 = vld [vmem:[#allocation5 + $0x2] sm:$0x1]  ;;  %vm1814_vm3 = vcmask 1041408  }
  0x37   :  { %2010 = vmatprep.subr.bf16.mxu0 %v2484_v0  ;;  %2018 = vmatprep.subr.bf16.mxu1 %v2484_v0  ;;  %v279_v17 = vpack.c.bf16 %v219_v16, %v219_v16  ;;  %v2564_v41 = vld [vmem:[#allocation7 + $0x38] sm:$0xff]   ;;  %v2567_v42 = vld [vmem:[#allocation7 + $0x30] sm:$0xff]   ;;  %v2573_v45 = vld [vmem:[#allocation7 + $0x28] sm:$0xff]   ;;  %vm1816_vm4 = vcmask 1042432   ;;  %vm1831_vm5 = vcmask 254976   ;;  %vm1840_vm6 = vcmask 7168  }
  0x38   :  { %v220_v43 = vld [vmem:[#allocation5 + $0x1] sm:$0x1]  ;;  %v2581_v47 = vld [vmem:[#allocation7 + $0x20] sm:$0xff]   ;;  %v2603_v56 = vld [vmem:[#allocation8 + $0x2] sm:$0x1]  ;;  %vm1847_vm7 = vcmask 1043456  }
  0x39   :  { %v223_v44 = vpack.c.bf16 %v220_v43, %v220_v43  ;;  %vm1849_vm8 = vcmask 1045504   ;;  %s2488_s9 = smov [#allocation10]  }
  0x3a   :  { %2011 = vmatpush3.bf16.msra.mxu0 %v2228_v2  ;;  %2019 = vmatpush3.bf16.msra.mxu1 %v2230_v6  ;;  %s1863_s10 = sshll.u32 %s2488_s9, 4  ;;  %s1864_s10 = int_to_ptr.vmem [resolvable:$true] %s1863_s10 }
  0x3b   :  { %2024 = vmatprep.subr.bf16.mxu0 %v2484_v0  ;;  %2032 = vmatprep.subr.bf16.mxu1 %v2484_v0  ;;  %s2450_s11 = scalar_lea.vmem %s1864_s10, 128  ;;  %p2455_p7 = scmp.lt.s32.totalorder %s1864_s10, %s1864_s10 }
  0x3c   :  { %p2451_p6 = scmp.ne.s32.totalorder %s1864_s10, %s2450_s11  ;;  %p2456_p8 = scmp.lt.s32.totalorder %s2450_s11, %s2450_s11 }
  0x3d   :  { %2013 = vmatmul.mubr.msk.bf16.vlgmr.msra.gmra.mxu0 %vm115_vm1, %v98_v5 }
  0x3e   :  { %2028 = vmatprep.mubr.msk.bf16.mxu0 %vm2485_vm0, %v2484_v0  ;;  %2025 = vmatpush3.bf16.msra.mxu0 %v2564_v41  ;;  %p2457_p9 = por %p2456_p8, %p2455_p7 }
  0x3f   :  { %2026 = vmatprep.subr.bf16.mxu0 %v2484_v0 }
  0x40   :  { %p2458_p10 = pnand %p2457_p9, %p2451_p6 }
  0x42   :  { %2027 = vmatpush3.bf16.msra.mxu0 %v2567_v42 }
  0x43   :  { %2040 = vmatprep.subr.bf16.mxu0 %v2484_v0 }
  0x45   :  { %2029 = vmatmul.mubr.msk.bf16.vlgmr.msra.gmra.mxu0 %vm115_vm1, %v223_v44 }
  0x46   :  { %2041 = vmatpush3.bf16.msra.mxu0 %v2573_v45  ;;  %2044 = vmatprep.mubr.msk.bf16.mxu0 %vm2485_vm0, %v2484_v0 }
  0x47   :  { %2042 = vmatprep.subr.bf16.mxu0 %v2484_v0 }
  0x4a   :  { %2043 = vmatpush3.bf16.msra.mxu0 %v2581_v47 }
  0x4b   :  { %2056 = vmatprep.subr.bf16.mxu0 %v2484_v0 }
  0xfd   :  { %v153_v8 = vpop.f32.mrf.mxu0 }
  0xfe   :  { %v154_v9 = vadd.f32 %v1874_v7, %v153_v8  ;;  %v222_v7 = vld [vmem:[#allocation5 + $0x3] sm:$0x1] }
  0xff   :  { %v2014_v10 = vpop.f32.mrf.mxu0 }
 0x100   :  { %v159_v12 = vpack.c.bf16 %v154_v9, %v154_v9 }
 0x101   :  { %v156_v13 = vpop.f32.mrf.mxu0 }
 0x102   :  { %2021 = vmatmul.mubr.msk.bf16.vlgmr.msra.gmra.mxu1 %vm115_vm1, %v159_v12 }
 0x103   :  { %2033 = vmatpush3.bf16.msra.mxu1 %v2541_v11  ;;  %v2015_v14 = vpop.f32.mrf.mxu0  ;;  %2036 = vmatprep.mubr.msk.bf16.mxu1 %vm2485_vm0, %v2484_v0 }
 0x104   :  { %2034 = vmatprep.subr.bf16.mxu1 %v2484_v0 }
 0x105   :  { %v273_v51 = vpop.f32.mrf.mxu0 }
 0x107   :  { %2035 = vmatpush3.bf16.msra.mxu1 %v2545_v15  ;;  %v2030_v52 = vpop.f32.mrf.mxu0 }
 0x108   :  { %2048 = vmatprep.subr.bf16.mxu1 %v2484_v0 }
 0x109   :  { %v276_v53 = vpop.f32.mrf.mxu0 }
 0x10a   :  { %2037 = vmatmul.mubr.msk.bf16.vlgmr.msra.gmra.mxu1 %vm115_vm1, %v279_v17 }
 0x10b   :  { %2052 = vmatprep.mubr.msk.bf16.mxu1 %vm2485_vm0, %v2484_v0  ;;  %2049 = vmatpush3.bf16.msra.mxu1 %v2564_v41  ;;  %v2031_v54 = vpop.f32.mrf.mxu0 }
 0x10c   :  { %2050 = vmatprep.subr.bf16.mxu1 %v2484_v0 }
 0x10f   :  { %2051 = vmatpush3.bf16.msra.mxu1 %v2567_v42 }
 0x110   :  { %2064 = vmatprep.subr.bf16.mxu1 %v2484_v0 }
 0x1c2   :  { %v213_v18 = vpop.f32.mrf.mxu1 }
 0x1c3   :  { %v2555_v23 = vadd.f32 %v1878_v20, %v213_v18 }
 0x1c4   :  { %v2022_v19 = vpop.f32.mrf.mxu1 }
 0x1c6   :  { %v216_v21 = vpop.f32.mrf.mxu1 }
 0x1c8   :  { %v2023_v22 = vpop.f32.mrf.mxu1 }
 0x1ca   :  { %v329_v24 = vpop.f32.mrf.mxu1 }
 0x1cb   :  { %v335_v25 = vadd.f32 %v329_v24, %v2555_v23 }
 0x1cc   :  { %v2038_v26 = vpop.f32.mrf.mxu1 }
 0x1cd   :  { %2237 = vtanh.f32 %v335_v25  ;;  %v1888_v31 = vmul.f32 -1.442695, %v335_v25 }
 0x1ce   :  { %v332_v27 = vpop.f32.mrf.mxu1 }
 0x1cf   :  { %2239 = vpow2.f32 %v1888_v31 }
 0x1d0   :  { %v2039_v28 = vpop.f32.mrf.mxu1 }
 0x1da   :  { %v2238_v29 = vpop.eup %2237 }
 0x1db   :  { %349 = vrot.lane.b32.xlu0 %v2238_v29, %s2481_s1 }
 0x1dc   :  { %v2240_v32 = vpop.eup %2239 }
 0x1dd   :  { %v339_v33 = vadd.f32 1.0, %v2240_v32 }
 0x1df   :  { %344 = vrot.lane.b32.xlu0 %v221_v30, %s2486_s2  ;;  %2241 = vrcp.f32 %v339_v33 }
 0x1ec   :  { %v2242_v34 = vpop.eup %2241 }
 0x24d   :  { %v350_v35 = vpop.permute.xlu0 %349 }
 0x24e   :  { %v352_v36 = vmul.f32 %v2242_v34, %v350_v35 }
 0x250   :  { %354 = vrot.lane.b32.xlu1 %v352_v36, %s2486_s2 }
 0x251   :  { %v345_v37 = vpop.permute.xlu0 %344 }
 0x252   :  { %v347_v38 = vmul.f32 %v2242_v34, %v345_v37 }
 0x2c2   :  { %v355_v39 = vpop.permute.xlu1 %354 }
 0x2c3   :  { %v2561_v40 = vadd.f32 %v355_v39, %v347_v38 }
 0x2c5   :  { %2243 = vtanh.f32 %v2561_v40  ;;  %v551_v28 = vrot.slane %v2561_v40, 7 }
 0x2d2   :  { %v2244_v46 = vpop.eup %2243 }
 0x2d3   :  { %360 = vrot.lane.b32.xlu1 %v2244_v46, %s2481_s1 }
 0x345   :  { %v361_v48 = vpop.permute.xlu1 %360 }
 0x346   :  { %v363_v49 = vmul.f32 %v2242_v34, %v361_v48 }
 0x348   :  { %v364_v50 = vpack.c.bf16 %v363_v49, %v363_v49 }
 0x34a   :  { %366 = vrot.lane.b32.xlu0 %v364_v50, %s2486_s2 }
 0x3bc   :  { %v367_v55 = vpop.permute.xlu0 %366 }
 0x3bd   :  { %2045 = vmatmul.mubr.msk.bf16.vlgmr.msra.gmra.mxu0 %vm115_vm1, %v367_v55 }
 0x3be   :  { %2057 = vmatpush3.bf16.msra.mxu0 %v2541_v11  ;;  %2060 = vmatprep.mubr.msk.bf16.mxu0 %vm2485_vm0, %v2484_v0 }
 0x3bf   :  { %2058 = vmatprep.subr.bf16.mxu0 %v2484_v0 }
 0x3c2   :  { %2059 = vmatpush3.bf16.msra.mxu0 %v2545_v15 }
 0x3c3   :  { %2072 = vmatprep.subr.bf16.mxu0 %v2484_v0 }
 0x3c5   :  { %2061 = vmatmul.mubr.msk.bf16.vlgmr.msra.gmra.mxu0 %vm115_vm1, %v367_v55 }
 0x3c6   :  { %2073 = vmatpush3.bf16.msra.mxu0 %v2564_v41  ;;  %2076 = vmatprep.mubr.msk.bf16.mxu0 %vm2485_vm0, %v2484_v0 }
 0x3c7   :  { %2074 = vmatprep.subr.bf16.mxu0 %v2484_v0 }
 0x3ca   :  { %2075 = vmatpush3.bf16.msra.mxu0 %v2567_v42 }
 0x3cb   :  { %2088 = vmatprep.subr.bf16.mxu0 %v2484_v0 }
 0x47d   :  { %v417_v57 = vpop.f32.mrf.mxu0 }
 0x47e   :  { %v418_v58 = vadd.f32 %v417_v57, %v273_v51 }
 0x47f   :  { %v2046_v59 = vpop.f32.mrf.mxu0 }
 0x480   :  { %v423_v60 = vadd.f32 %v418_v58, %v2603_v56 }
 0x481   :  { %v420_v61 = vpop.f32.mrf.mxu0 }
 0x482   :  { %2245 = vtanh.f32 %v423_v60  ;;  %v1892_v9 = vmul.f32 -1.442695, %v423_v60 }
 0x483   :  { %v2047_v62 = vpop.f32.mrf.mxu0 }
 0x485   :  { %v533_v63 = vpop.f32.mrf.mxu0 }
 0x486   :  { %v540_v1 = vrot.slane %v533_v63, 7 }
 0x487   :  { %v2062_v2 = vpop.f32.mrf.mxu0 }
 0x488   :  { %v542_v3 = vadd.f32 %v540_v1, %v2555_v23 }
 0x489   :  { %v536_v4 = vpop.f32.mrf.mxu0 }
 0x48a   :  { %2247 = vtanh.f32 %v542_v3  ;;  %v1895_v10 = vmul.f32 -1.442695, %v542_v3 }
 0x48b   :  { %v2063_v5 = vpop.f32.mrf.mxu0  ;;  %2249 = vpow2.f32 %v1892_v9 }
 0x48c   :  { %2251 = vpow2.f32 %v1895_v10 }
 0x48f   :  { %v2246_v6 = vpop.eup %2245 }
 0x490   :  { %437 = vrot.lane.b32.xlu1 %v2246_v6, %s2481_s1 }
 0x494   :  { %432 = vrot.lane.b32.xlu1 %v222_v7, %s2486_s2 }
 0x497   :  { %v2248_v8 = vpop.eup %2247 }
 0x498   :  { %555 = vrot.lane.b32.xlu0 %v2248_v8, %s2481_s1  ;;  %v2250_v12 = vpop.eup %2249 }
 0x499   :  { %v427_v13 = vadd.f32 1.0, %v2250_v12  ;;  %v2252_v14 = vpop.eup %2251 }
 0x49a   :  { %v546_v16 = vadd.f32 1.0, %v2252_v14 }
 0x49b   :  { %2253 = vrcp.f32 %v427_v13 }
 0x49c   :  { %2255 = vrcp.f32 %v546_v16 }
 0x4a8   :  { %v2254_v17 = vpop.eup %2253 }
 0x4a9   :  { %v2256_v20 = vpop.eup %2255 }
 0x4aa   :  { %v553_v29 = vmul.f32 %v2256_v20, %v551_v28 }
 0x502   :  { %v438_v18 = vpop.permute.xlu1 %437 }
 0x503   :  { %v440_v19 = vmul.f32 %v2254_v17, %v438_v18 }
 0x505   :  { %442 = vrot.lane.b32.xlu0 %v440_v19, %s2486_s2 }
 0x506   :  { %v433_v24 = vpop.permute.xlu1 %432 }
 0x507   :  { %v435_v25 = vmul.f32 %v2254_v17, %v433_v24 }
 0x50a   :  { %v556_v21 = vpop.permute.xlu0 %555 }
 0x50b   :  { %v558_v22 = vmul.f32 %v2256_v20, %v556_v21 }
 0x50d   :  { %560 = vrot.lane.b32.xlu1 %v558_v22, %s2486_s2 }
 0x577   :  { %v443_v26 = vpop.permute.xlu0 %442 }
 0x578   :  { %v2612_v27 = vadd.f32 %v443_v26, %v435_v25 }
 0x57a   :  { %2257 = vtanh.f32 %v2612_v27 }
 0x57f   :  { %v561_v30 = vpop.permute.xlu1 %560 }
 0x580   :  { %v2616_v31 = vadd.f32 %v561_v30, %v553_v29 }
 0x582   :  { %2259 = vtanh.f32 %v2616_v31 }
 0x587   :  { %v2258_v32 = vpop.eup %2257 }
 0x588   :  { %448 = vrot.lane.b32.xlu0 %v2258_v32, %s2481_s1 }
 0x58f   :  { %v2260_v33 = vpop.eup %2259 }
 0x590   :  { %566 = vrot.lane.b32.xlu1 %v2260_v33, %s2481_s1 }
 0x5fa   :  { %v449_v34 = vpop.permute.xlu0 %448 }
 0x5fb   :  { %v451_v35 = vmul.f32 %v2254_v17, %v449_v34 }
 0x5fd   :  { %v452_v36 = vpack.c.bf16 %v451_v35, %v451_v35 }
 0x5ff   :  { %454 = vrot.lane.b32.xlu0 %v452_v36, %s2486_s2 }
 0x602   :  { %v567_v37 = vpop.permute.xlu1 %566 }
 0x603   :  { %v569_v38 = vmul.f32 %v2256_v20, %v567_v37  ;;  %v743_v20 = vrot.slane %v2616_v31, 7 }
 0x605   :  { %v570_v39 = vpack.c.bf16 %v569_v38, %v569_v38 }
 0x607   :  { %v572_v40 = vshrl.u32 %v570_v39, 16 }
 0x609   :  { %574 = vrot.lane.b32.xlu1 %v572_v40, %s2486_s2 }
 0x671   :  { %v455_v43 = vpop.permute.xlu0 %454 }
 0x672   :  { %2053 = vmatmul.mubr.msk.bf16.vlgmr.msra.gmra.mxu1 %vm115_vm1, %v455_v43 }
 0x673   :  { %2065 = vmatpush3.bf16.msra.mxu1 %v2573_v45  ;;  %2068 = vmatprep.mubr.msk.bf16.mxu1 %vm2485_vm0, %v2484_v0 }
 0x674   :  { %2066 = vmatprep.subr.bf16.mxu1 %v2484_v0 }
 0x677   :  { %2067 = vmatpush3.bf16.msra.mxu1 %v2581_v47 }
 0x678   :  { %2080 = vmatprep.subr.bf16.mxu1 %v2484_v0 }
 0x67b   :  { %v575_v44 = vpop.permute.xlu1 %574 }
 0x67c   :  { %2069 = vmatmul.mubr.msk.bf16.vlgmr.msra.gmra.mxu1 %vm115_vm1, %v575_v44 }
 0x67d   :  { %2081 = vmatpush3.bf16.msra.mxu1 %v2541_v11  ;;  %2084 = vmatprep.mubr.msk.bf16.mxu1 %vm2485_vm0, %v2484_v0 }
 0x67e   :  { %2082 = vmatprep.subr.bf16.mxu1 %v2484_v0 }
 0x681   :  { %2083 = vmatpush3.bf16.msra.mxu1 %v2545_v15 }
 0x682   :  { %2096 = vmatprep.subr.bf16.mxu1 %v2484_v0 }
 0x684   :  { %2085 = vmatmul.mubr.msk.bf16.vlgmr.msra.gmra.mxu1 %vm115_vm1, %v575_v44 }
 0x685   :  { %2097 = vmatpush3.bf16.msra.mxu1 %v2564_v41  ;;  %2100 = vmatprep.mubr.msk.bf16.mxu1 %vm2485_vm0, %v2484_v0 }
 0x686   :  { %2098 = vmatprep.subr.bf16.mxu1 %v2484_v0 }
 0x689   :  { %2099 = vmatpush3.bf16.msra.mxu1 %v2567_v42 }
 0x68a   :  { %2112 = vmatprep.subr.bf16.mxu1 %v2484_v0 }
 0x732   :  { %v493_v46 = vpop.f32.mrf.mxu1 }
 0x734   :  { %v2054_v48 = vpop.f32.mrf.mxu1 }
 0x736   :  { %v496_v49 = vpop.f32.mrf.mxu1 }
 0x738   :  { %v2055_v50 = vpop.f32.mrf.mxu1 }
 0x73c   :  { %v613_v51 = vpop.f32.mrf.mxu1 }
 0x73d   :  { %v614_v52 = vadd.f32 %v613_v51, %v493_v46 }
 0x73e   :  { %v2070_v53 = vpop.f32.mrf.mxu1 }
 0x73f   :  { %v619_v54 = vadd.f32 %v614_v52, %v2603_v56 }
 0x740   :  { %v616_v55 = vpop.f32.mrf.mxu1 }
 0x741   :  { %2261 = vtanh.f32 %v619_v54  ;;  %v1897_v3 = vmul.f32 -1.442695, %v619_v54 }
 0x742   :  { %v2071_v57 = vpop.f32.mrf.mxu1 }
 0x744   :  { %v725_v58 = vpop.f32.mrf.mxu1 }
 0x745   :  { %v732_v59 = vrot.slane %v725_v58, 6 }
 0x746   :  { %v2086_v60 = vpop.f32.mrf.mxu1 }
 0x747   :  { %v734_v61 = vadd.f32 %v732_v59, %v2555_v23 }
 0x748   :  { %v728_v62 = vpop.f32.mrf.mxu1 }
 0x749   :  { %2263 = vtanh.f32 %v734_v61  ;;  %v1900_v4 = vmul.f32 -1.442695, %v734_v61 }
 0x74a   :  { %v2087_v63 = vpop.f32.mrf.mxu1  ;;  %2265 = vpow2.f32 %v1897_v3 }
 0x74b   :  { %2267 = vpow2.f32 %v1900_v4 }
 0x74e   :  { %v2262_v1 = vpop.eup %2261 }
 0x74f   :  { %629 = vrot.lane.b32.xlu0 %v2262_v1, %s2481_s1 }
 0x756   :  { %v2264_v2 = vpop.eup %2263 }
 0x757   :  { %747 = vrot.lane.b32.xlu1 %v2264_v2, %s2481_s1  ;;  %v2266_v5 = vpop.eup %2265 }
 0x758   :  { %v623_v6 = vadd.f32 1.0, %v2266_v5  ;;  %v2268_v7 = vpop.eup %2267 }
 0x759   :  { %v738_v8 = vadd.f32 1.0, %v2268_v7 }
 0x75a   :  { %2269 = vrcp.f32 %v623_v6 }
 0x75b   :  { %2271 = vrcp.f32 %v738_v8 }
 0x767   :  { %v2270_v9 = vpop.eup %2269 }
 0x768   :  { %v2272_v13 = vpop.eup %2271  ;;  %v627_v17 = vmul.f32 %v2270_v9, %v2612_v27 }
 0x769   :  { %v745_v21 = vmul.f32 %v2272_v13, %v743_v20 }
 0x7c1   :  { %v630_v10 = vpop.permute.xlu0 %629 }
 0x7c2   :  { %v632_v12 = vmul.f32 %v2270_v9, %v630_v10 }
 0x7c4   :  { %634 = vrot.lane.b32.xlu0 %v632_v12, %s2486_s2 }
 0x7c9   :  { %v748_v14 = vpop.permute.xlu1 %747 }
 0x7ca   :  { %v750_v16 = vmul.f32 %v2272_v13, %v748_v14 }
 0x7cc   :  { %752 = vrot.lane.b32.xlu1 %v750_v16, %s2486_s2 }
 0x836   :  { %v635_v18 = vpop.permute.xlu0 %634 }
 0x837   :  { %v2651_v19 = vadd.f32 %v635_v18, %v627_v17 }
 0x839   :  { %2273 = vtanh.f32 %v2651_v19 }
 0x83e   :  { %v753_v22 = vpop.permute.xlu1 %752 }
 0x83f   :  { %v2655_v24 = vadd.f32 %v753_v22, %v745_v21 }
 0x841   :  { %2275 = vtanh.f32 %v2655_v24  ;;  %v934_v12 = vrot.slane %v2655_v24, 7 }
 0x846   :  { %v2274_v25 = vpop.eup %2273 }
 0x847   :  { %640 = vrot.lane.b32.xlu0 %v2274_v25, %s2481_s1 }
 0x84e   :  { %v2276_v26 = vpop.eup %2275 }
 0x84f   :  { %758 = vrot.lane.b32.xlu1 %v2276_v26, %s2481_s1 }
 0x8b9   :  { %v641_v27 = vpop.permute.xlu0 %640 }
 0x8ba   :  { %v643_v28 = vmul.f32 %v2270_v9, %v641_v27 }
 0x8bc   :  { %v644_v29 = vpack.c.bf16 %v643_v28, %v643_v28 }
 0x8be   :  { %646 = vrot.lane.b32.xlu0 %v644_v29, %s2486_s2 }
 0x8c1   :  { %v759_v30 = vpop.permute.xlu1 %758 }
 0x8c2   :  { %v761_v32 = vmul.f32 %v2272_v13, %v759_v30 }
 0x8c4   :  { %v762_v31 = vpack.c.bf16 %v761_v32, %v761_v32 }
 0x8c6   :  { %v764_v33 = vrot.slane %v762_v31, 1 }
 0x8c8   :  { %765 = vrot.lane.b32.xlu1 %v764_v33, %s2486_s2 }
 0x930   :  { %v647_v34 = vpop.permute.xlu0 %646 }
 0x931   :  { %2077 = vmatmul.mubr.msk.bf16.vlgmr.msra.gmra.mxu0 %vm115_vm1, %v647_v34 }
 0x932   :  { %2089 = vmatpush3.bf16.msra.mxu0 %v2573_v45  ;;  %2092 = vmatprep.mubr.msk.bf16.mxu0 %vm2485_vm0, %v2484_v0 }
 0x933   :  { %2090 = vmatprep.subr.bf16.mxu0 %v2484_v0 }
 0x936   :  { %2091 = vmatpush3.bf16.msra.mxu0 %v2581_v47 }
 0x937   :  { %2104 = vmatprep.subr.bf16.mxu0 %v2484_v0 }
 0x93a   :  { %v766_v35 = vpop.permute.xlu1 %765 }
 0x93b   :  { %2093 = vmatmul.mubr.msk.bf16.vlgmr.msra.gmra.mxu0 %vm115_vm1, %v766_v35 }
 0x93c   :  { %2105 = vmatpush3.bf16.msra.mxu0 %v2541_v11  ;;  %2108 = vmatprep.mubr.msk.bf16.mxu0 %vm2485_vm0, %v2484_v0 }
 0x93d   :  { %2106 = vmatprep.subr.bf16.mxu0 %v2484_v0 }
 0x940   :  { %2107 = vmatpush3.bf16.msra.mxu0 %v2545_v15 }
 0x941   :  { %2120 = vmatprep.subr.bf16.mxu0 %v2484_v0 }
 0x943   :  { %2109 = vmatmul.mubr.msk.bf16.vlgmr.msra.gmra.mxu0 %vm115_vm1, %v766_v35 }
 0x944   :  { %2121 = vmatpush3.bf16.msra.mxu0 %v2564_v41  ;;  %2124 = vmatprep.mubr.msk.bf16.mxu0 %vm2485_vm0, %v2484_v0 }
 0x945   :  { %2122 = vmatprep.subr.bf16.mxu0 %v2484_v0 }
 0x948   :  { %2123 = vmatpush3.bf16.msra.mxu0 %v2567_v42 }
 0x949   :  { %2136 = vmatprep.subr.bf16.mxu0 %v2484_v0 }
 0x9f1   :  { %v685_v36 = vpop.f32.mrf.mxu0 }
 0x9f3   :  { %v2078_v37 = vpop.f32.mrf.mxu0 }
 0x9f5   :  { %v688_v38 = vpop.f32.mrf.mxu0 }
 0x9f7   :  { %v2079_v39 = vpop.f32.mrf.mxu0 }
 0x9fb   :  { %v804_v40 = vpop.f32.mrf.mxu0 }
 0x9fc   :  { %v805_v43 = vadd.f32 %v804_v40, %v685_v36 }
 0x9fd   :  { %v2094_v44 = vpop.f32.mrf.mxu0 }
 0x9fe   :  { %v810_v46 = vadd.f32 %v805_v43, %v2603_v56 }
 0x9ff   :  { %v807_v48 = vpop.f32.mrf.mxu0 }
 0xa00   :  { %2277 = vtanh.f32 %v810_v46  ;;  %v1902_v59 = vmul.f32 -1.442695, %v810_v46 }
 0xa01   :  { %v2095_v49 = vpop.f32.mrf.mxu0 }
 0xa03   :  { %v916_v50 = vpop.f32.mrf.mxu0 }
 0xa04   :  { %v923_v51 = vrot.slane %v916_v50, 5 }
 0xa05   :  { %v2110_v52 = vpop.f32.mrf.mxu0 }
 0xa06   :  { %v925_v53 = vadd.f32 %v923_v51, %v2555_v23 }
 0xa07   :  { %v919_v54 = vpop.f32.mrf.mxu0 }
 0xa08   :  { %2279 = vtanh.f32 %v925_v53  ;;  %v1905_v60 = vmul.f32 -1.442695, %v925_v53 }
 0xa09   :  { %v2111_v55 = vpop.f32.mrf.mxu0  ;;  %2281 = vpow2.f32 %v1902_v59 }
 0xa0a   :  { %2283 = vpow2.f32 %v1905_v60 }
 0xa0d   :  { %v2278_v57 = vpop.eup %2277 }
 0xa0e   :  { %820 = vrot.lane.b32.xlu0 %v2278_v57, %s2481_s1 }
 0xa15   :  { %v2280_v58 = vpop.eup %2279 }
 0xa16   :  { %938 = vrot.lane.b32.xlu1 %v2280_v58, %s2481_s1  ;;  %v2282_v61 = vpop.eup %2281 }
 0xa17   :  { %v814_v62 = vadd.f32 1.0, %v2282_v61  ;;  %v2284_v63 = vpop.eup %2283 }
 0xa18   :  { %v929_v1 = vadd.f32 1.0, %v2284_v63 }
 0xa19   :  { %2285 = vrcp.f32 %v814_v62 }
 0xa1a   :  { %2287 = vrcp.f32 %v929_v1 }
 0xa26   :  { %v2286_v2 = vpop.eup %2285 }
 0xa27   :  { %v2288_v5 = vpop.eup %2287  ;;  %v818_v8 = vmul.f32 %v2286_v2, %v2651_v19 }
 0xa28   :  { %v936_v13 = vmul.f32 %v2288_v5, %v934_v12 }
 0xa80   :  { %v821_v3 = vpop.permute.xlu0 %820 }
 0xa81   :  { %v823_v4 = vmul.f32 %v2286_v2, %v821_v3 }
 0xa83   :  { %825 = vrot.lane.b32.xlu0 %v823_v4, %s2486_s2 }
 0xa88   :  { %v939_v6 = vpop.permute.xlu1 %938 }
 0xa89   :  { %v941_v7 = vmul.f32 %v2288_v5, %v939_v6 }
 0xa8b   :  { %943 = vrot.lane.b32.xlu1 %v941_v7, %s2486_s2 }
 0xaf5   :  { %v826_v9 = vpop.permute.xlu0 %825 }
 0xaf6   :  { %v2690_v10 = vadd.f32 %v826_v9, %v818_v8 }
 0xaf8   :  { %2289 = vtanh.f32 %v2690_v10 }
 0xafd   :  { %v944_v14 = vpop.permute.xlu1 %943 }
 0xafe   :  { %v2694_v16 = vadd.f32 %v944_v14, %v936_v13 }
 0xb00   :  { %2291 = vtanh.f32 %v2694_v16 }
 0xb05   :  { %v2290_v17 = vpop.eup %2289 }
 0xb06   :  { %831 = vrot.lane.b32.xlu0 %v2290_v17, %s2481_s1 }
 0xb0d   :  { %v2292_v18 = vpop.eup %2291 }
 0xb0e   :  { %949 = vrot.lane.b32.xlu1 %v2292_v18, %s2481_s1 }
 0xb78   :  { %v832_v19 = vpop.permute.xlu0 %831 }
 0xb79   :  { %v834_v20 = vmul.f32 %v2286_v2, %v832_v19 }
 0xb7b   :  { %v835_v21 = vpack.c.bf16 %v834_v20, %v834_v20 }
 0xb7d   :  { %837 = vrot.lane.b32.xlu0 %v835_v21, %s2486_s2 }
 0xb80   :  { %v950_v22 = vpop.permute.xlu1 %949 }
 0xb81   :  { %v952_v25 = vmul.f32 %v2288_v5, %v950_v22  ;;  %v1127_v5 = vrot.slane %v2694_v16, 7 }
 0xb83   :  { %v953_v24 = vpack.c.bf16 %v952_v25, %v952_v25 }
 0xb85   :  { %v955_v26 = vshrl.u32 %v953_v24, 16 }
 0xb87   :  { %v957_v27 = vrot.slane %v955_v26, 1 }
 0xb89   :  { %958 = vrot.lane.b32.xlu1 %v957_v27, %s2486_s2 }
 0xbef   :  { %v838_v28 = vpop.permute.xlu0 %837 }
 0xbf0   :  { %2101 = vmatmul.mubr.msk.bf16.vlgmr.msra.gmra.mxu1 %vm115_vm1, %v838_v28 }
 0xbf1   :  { %2113 = vmatpush3.bf16.msra.mxu1 %v2573_v45  ;;  %2116 = vmatprep.mubr.msk.bf16.mxu1 %vm2485_vm0, %v2484_v0 }
 0xbf2   :  { %2114 = vmatprep.subr.bf16.mxu1 %v2484_v0 }
 0xbf5   :  { %2115 = vmatpush3.bf16.msra.mxu1 %v2581_v47 }
 0xbf6   :  { %2128 = vmatprep.subr.bf16.mxu1 %v2484_v0 }
 0xbfb   :  { %v959_v29 = vpop.permute.xlu1 %958 }
 0xbfc   :  { %2117 = vmatmul.mubr.msk.bf16.vlgmr.msra.gmra.mxu1 %vm115_vm1, %v959_v29 }
 0xbfd   :  { %2129 = vmatpush3.bf16.msra.mxu1 %v2541_v11  ;;  %2132 = vmatprep.mubr.msk.bf16.mxu1 %vm2485_vm0, %v2484_v0 }
 0xbfe   :  { %2130 = vmatprep.subr.bf16.mxu1 %v2484_v0 }
 0xc01   :  { %2131 = vmatpush3.bf16.msra.mxu1 %v2545_v15 }
 0xc02   :  { %2144 = vmatprep.subr.bf16.mxu1 %v2484_v0 }
 0xc04   :  { %2133 = vmatmul.mubr.msk.bf16.vlgmr.msra.gmra.mxu1 %vm115_vm1, %v959_v29 }
 0xc05   :  { %2145 = vmatpush3.bf16.msra.mxu1 %v2564_v41  ;;  %2148 = vmatprep.mubr.msk.bf16.mxu1 %vm2485_vm0, %v2484_v0 }
 0xc06   :  { %2146 = vmatprep.subr.bf16.mxu1 %v2484_v0 }
 0xc09   :  { %2147 = vmatpush3.bf16.msra.mxu1 %v2567_v42 }
 0xc0a   :  { %2160 = vmatprep.subr.bf16.mxu1 %v2484_v0 }
 0xcb0   :  { %v876_v30 = vpop.f32.mrf.mxu1 }
 0xcb2   :  { %v2102_v32 = vpop.f32.mrf.mxu1 }
 0xcb4   :  { %v879_v31 = vpop.f32.mrf.mxu1 }
 0xcb6   :  { %v2103_v33 = vpop.f32.mrf.mxu1 }
 0xcbc   :  { %v997_v34 = vpop.f32.mrf.mxu1 }
 0xcbd   :  { %v998_v35 = vadd.f32 %v997_v34, %v876_v30 }
 0xcbe   :  { %v2118_v36 = vpop.f32.mrf.mxu1 }
 0xcbf   :  { %v1003_v37 = vadd.f32 %v998_v35, %v2603_v56 }
 0xcc0   :  { %v1000_v38 = vpop.f32.mrf.mxu1 }
 0xcc1   :  { %2293 = vtanh.f32 %v1003_v37  ;;  %v1907_v52 = vmul.f32 -1.442695, %v1003_v37 }
 0xcc2   :  { %v2119_v39 = vpop.f32.mrf.mxu1 }
 0xcc4   :  { %v1109_v40 = vpop.f32.mrf.mxu1 }
 0xcc5   :  { %v1116_v43 = vrot.slane %v1109_v40, 4 }
 0xcc6   :  { %v2134_v44 = vpop.f32.mrf.mxu1 }
 0xcc7   :  { %v1118_v46 = vadd.f32 %v1116_v43, %v2555_v23 }
 0xcc8   :  { %v1112_v48 = vpop.f32.mrf.mxu1 }
 0xcc9   :  { %2295 = vtanh.f32 %v1118_v46  ;;  %v1910_v53 = vmul.f32 -1.442695, %v1118_v46 }
 0xcca   :  { %v2135_v49 = vpop.f32.mrf.mxu1  ;;  %2297 = vpow2.f32 %v1907_v52 }
 0xccb   :  { %2299 = vpow2.f32 %v1910_v53 }
 0xcce   :  { %v2294_v50 = vpop.eup %2293 }
 0xccf   :  { %1013 = vrot.lane.b32.xlu0 %v2294_v50, %s2481_s1 }
 0xcd6   :  { %v2296_v51 = vpop.eup %2295 }
 0xcd7   :  { %1131 = vrot.lane.b32.xlu1 %v2296_v51, %s2481_s1  ;;  %v2298_v54 = vpop.eup %2297 }
 0xcd8   :  { %v1007_v55 = vadd.f32 1.0, %v2298_v54  ;;  %v2300_v57 = vpop.eup %2299 }
 0xcd9   :  { %v1122_v58 = vadd.f32 1.0, %v2300_v57 }
 0xcda   :  { %2301 = vrcp.f32 %v1007_v55 }
 0xcdb   :  { %2303 = vrcp.f32 %v1122_v58 }
 0xce7   :  { %v2302_v59 = vpop.eup %2301 }
 0xce8   :  { %v2304_v62 = vpop.eup %2303  ;;  %v1011_v2 = vmul.f32 %v2302_v59, %v2690_v10 }
 0xce9   :  { %v1129_v6 = vmul.f32 %v2304_v62, %v1127_v5 }
 0xd41   :  { %v1014_v60 = vpop.permute.xlu0 %1013 }
 0xd42   :  { %v1016_v61 = vmul.f32 %v2302_v59, %v1014_v60 }
 0xd44   :  { %1018 = vrot.lane.b32.xlu0 %v1016_v61, %s2486_s2 }
 0xd49   :  { %v1132_v63 = vpop.permute.xlu1 %1131 }
 0xd4a   :  { %v1134_v1 = vmul.f32 %v2304_v62, %v1132_v63 }
 0xd4c   :  { %1136 = vrot.lane.b32.xlu1 %v1134_v1, %s2486_s2 }
 0xdb6   :  { %v1019_v3 = vpop.permute.xlu0 %1018 }
 0xdb7   :  { %v2729_v4 = vadd.f32 %v1019_v3, %v1011_v2 }
 0xdb9   :  { %2305 = vtanh.f32 %v2729_v4 }
 0xdbe   :  { %v1137_v7 = vpop.permute.xlu1 %1136 }
 0xdbf   :  { %v2733_v8 = vadd.f32 %v1137_v7, %v1129_v6 }
 0xdc1   :  { %2307 = vtanh.f32 %v2733_v8  ;;  %v1318_v61 = vrot.slane %v2733_v8, 7 }
 0xdc6   :  { %v2306_v9 = vpop.eup %2305 }
 0xdc7   :  { %1024 = vrot.lane.b32.xlu0 %v2306_v9, %s2481_s1 }
 0xdce   :  { %v2308_v12 = vpop.eup %2307 }
 0xdcf   :  { %1142 = vrot.lane.b32.xlu1 %v2308_v12, %s2481_s1 }
 0xe39   :  { %v1025_v10 = vpop.permute.xlu0 %1024 }
 0xe3a   :  { %v1027_v13 = vmul.f32 %v2302_v59, %v1025_v10 }
 0xe3c   :  { %v1028_v14 = vpack.c.bf16 %v1027_v13, %v1027_v13 }
 0xe3e   :  { %1030 = vrot.lane.b32.xlu0 %v1028_v14, %s2486_s2 }
 0xe41   :  { %v1143_v17 = vpop.permute.xlu1 %1142 }
 0xe42   :  { %v1145_v18 = vmul.f32 %v2304_v62, %v1143_v17 }
 0xe44   :  { %v1146_v16 = vpack.c.bf16 %v1145_v18, %v1145_v18 }
 0xe46   :  { %v1148_v19 = vrot.slane %v1146_v16, 2 }
 0xe48   :  { %1149 = vrot.lane.b32.xlu1 %v1148_v19, %s2486_s2 }
 0xeb0   :  { %v1031_v20 = vpop.permute.xlu0 %1030 }
 0xeb1   :  { %2125 = vmatmul.mubr.msk.bf16.vlgmr.msra.gmra.mxu0 %vm115_vm1, %v1031_v20 }
 0xeb2   :  { %2137 = vmatpush3.bf16.msra.mxu0 %v2573_v45  ;;  %2140 = vmatprep.mubr.msk.bf16.mxu0 %vm2485_vm0, %v2484_v0 }
 0xeb3   :  { %2138 = vmatprep.subr.bf16.mxu0 %v2484_v0 }
 0xeb6   :  { %2139 = vmatpush3.bf16.msra.mxu0 %v2581_v47 }
 0xeb7   :  { %2152 = vmatprep.subr.bf16.mxu0 %v2484_v0 }
 0xeba   :  { %v1150_v21 = vpop.permute.xlu1 %1149 }
 0xebb   :  { %2141 = vmatmul.mubr.msk.bf16.vlgmr.msra.gmra.mxu0 %vm115_vm1, %v1150_v21 }
 0xebc   :  { %2153 = vmatpush3.bf16.msra.mxu0 %v2541_v11  ;;  %2156 = vmatprep.mubr.msk.bf16.mxu0 %vm2485_vm0, %v2484_v0 }
 0xebd   :  { %2154 = vmatprep.subr.bf16.mxu0 %v2484_v0 }
 0xec0   :  { %2155 = vmatpush3.bf16.msra.mxu0 %v2545_v15 }
 0xec1   :  { %2168 = vmatprep.subr.bf16.mxu0 %v2484_v0 }
 0xec3   :  { %2157 = vmatmul.mubr.msk.bf16.vlgmr.msra.gmra.mxu0 %vm115_vm1, %v1150_v21 }
 0xec4   :  { %2169 = vmatpush3.bf16.msra.mxu0 %v2564_v41  ;;  %2172 = vmatprep.mubr.msk.bf16.mxu0 %vm2485_vm0, %v2484_v0 }
 0xec5   :  { %2170 = vmatprep.subr.bf16.mxu0 %v2484_v0 }
 0xec8   :  { %2171 = vmatpush3.bf16.msra.mxu0 %v2567_v42 }
 0xec9   :  { %2184 = vmatprep.subr.bf16.mxu0 %v2484_v0 }
 0xf71   :  { %v1069_v22 = vpop.f32.mrf.mxu0 }
 0xf73   :  { %v2126_v25 = vpop.f32.mrf.mxu0 }
 0xf75   :  { %v1072_v24 = vpop.f32.mrf.mxu0 }
 0xf77   :  { %v2127_v26 = vpop.f32.mrf.mxu0 }
 0xf7b   :  { %v1188_v27 = vpop.f32.mrf.mxu0 }
 0xf7c   :  { %v1189_v28 = vadd.f32 %v1188_v27, %v1069_v22 }
 0xf7d   :  { %v2142_v29 = vpop.f32.mrf.mxu0 }
 0xf7e   :  { %v1194_v30 = vadd.f32 %v1189_v28, %v2603_v56 }
 0xf7f   :  { %v1191_v32 = vpop.f32.mrf.mxu0 }
 0xf80   :  { %2309 = vtanh.f32 %v1194_v30  ;;  %v1912_v43 = vmul.f32 -1.442695, %v1194_v30 }
 0xf81   :  { %v2143_v31 = vpop.f32.mrf.mxu0 }
 0xf83   :  { %v1300_v33 = vpop.f32.mrf.mxu0 }
 0xf84   :  { %v1307_v34 = vrot.slane %v1300_v33, 3 }
 0xf85   :  { %v2158_v35 = vpop.f32.mrf.mxu0 }
 0xf86   :  { %v1309_v36 = vadd.f32 %v1307_v34, %v2555_v23 }
 0xf87   :  { %v1303_v37 = vpop.f32.mrf.mxu0 }
 0xf88   :  { %2311 = vtanh.f32 %v1309_v36  ;;  %v1915_v44 = vmul.f32 -1.442695, %v1309_v36 }
 0xf89   :  { %v2159_v38 = vpop.f32.mrf.mxu0  ;;  %2313 = vpow2.f32 %v1912_v43 }
 0xf8a   :  { %2315 = vpow2.f32 %v1915_v44 }
 0xf8d   :  { %v2310_v39 = vpop.eup %2309 }
 0xf8e   :  { %1204 = vrot.lane.b32.xlu0 %v2310_v39, %s2481_s1 }
 0xf95   :  { %v2312_v40 = vpop.eup %2311 }
 0xf96   :  { %1322 = vrot.lane.b32.xlu1 %v2312_v40, %s2481_s1  ;;  %v2314_v46 = vpop.eup %2313 }
 0xf97   :  { %v1198_v48 = vadd.f32 1.0, %v2314_v46  ;;  %v2316_v49 = vpop.eup %2315 }
 0xf98   :  { %v1313_v50 = vadd.f32 1.0, %v2316_v49 }
 0xf99   :  { %2317 = vrcp.f32 %v1198_v48 }
 0xf9a   :  { %2319 = vrcp.f32 %v1313_v50 }
 0xfa6   :  { %v2318_v51 = vpop.eup %2317 }
 0xfa7   :  { %v2320_v54 = vpop.eup %2319  ;;  %v1202_v58 = vmul.f32 %v2318_v51, %v2729_v4 }
 0xfa8   :  { %v1320_v62 = vmul.f32 %v2320_v54, %v1318_v61 }
0x1000   :  { %v1205_v52 = vpop.permute.xlu0 %1204 }
0x1001   :  { %v1207_v53 = vmul.f32 %v2318_v51, %v1205_v52 }
0x1003   :  { %1209 = vrot.lane.b32.xlu0 %v1207_v53, %s2486_s2 }
0x1008   :  { %v1323_v55 = vpop.permute.xlu1 %1322 }
0x1009   :  { %v1325_v57 = vmul.f32 %v2320_v54, %v1323_v55 }
0x100b   :  { %1327 = vrot.lane.b32.xlu1 %v1325_v57, %s2486_s2 }
0x1075   :  { %v1210_v59 = vpop.permute.xlu0 %1209 }
0x1076   :  { %v2768_v60 = vadd.f32 %v1210_v59, %v1202_v58 }
0x1078   :  { %2321 = vtanh.f32 %v2768_v60 }
0x107d   :  { %v1328_v63 = vpop.permute.xlu1 %1327 }
0x107e   :  { %v2772_v1 = vadd.f32 %v1328_v63, %v1320_v62 }
0x1080   :  { %2323 = vtanh.f32 %v2772_v1  ;;  %v1511_v50 = vrot.slane %v2772_v1, 7 }
0x1085   :  { %v2322_v2 = vpop.eup %2321 }
0x1086   :  { %1215 = vrot.lane.b32.xlu0 %v2322_v2, %s2481_s1 }
0x108d   :  { %v2324_v3 = vpop.eup %2323 }
0x108e   :  { %1333 = vrot.lane.b32.xlu1 %v2324_v3, %s2481_s1  ;;  %v2365_v3 = vld [vmem:[#allocation7 + $0x18] sm:$0xff]  }
0x10f8   :  { %v1216_v4 = vpop.permute.xlu0 %1215 }
0x10f9   :  { %v1218_v5 = vmul.f32 %v2318_v51, %v1216_v4 }
0x10fb   :  { %v1219_v6 = vpack.c.bf16 %v1218_v5, %v1218_v5 }
0x10fd   :  { %1221 = vrot.lane.b32.xlu0 %v1219_v6, %s2486_s2 }
0x1100   :  { %v1334_v7 = vpop.permute.xlu1 %1333 }
0x1101   :  { %v1336_v9 = vmul.f32 %v2320_v54, %v1334_v7 }
0x1103   :  { %v1337_v8 = vpack.c.bf16 %v1336_v9, %v1336_v9 }
0x1105   :  { %v1339_v12 = vshrl.u32 %v1337_v8, 16 }
0x1107   :  { %v1341_v10 = vrot.slane %v1339_v12, 2 }
0x1109   :  { %1342 = vrot.lane.b32.xlu1 %v1341_v10, %s2486_s2 }
0x116f   :  { %v1222_v13 = vpop.permute.xlu0 %1221 }
0x1170   :  { %2149 = vmatmul.mubr.msk.bf16.vlgmr.msra.gmra.mxu1 %vm115_vm1, %v1222_v13 }
0x1171   :  { %2161 = vmatpush3.bf16.msra.mxu1 %v2573_v45  ;;  %2164 = vmatprep.mubr.msk.bf16.mxu1 %vm2485_vm0, %v2484_v0 }
0x1172   :  { %2162 = vmatprep.subr.bf16.mxu1 %v2484_v0 }
0x1175   :  { %2163 = vmatpush3.bf16.msra.mxu1 %v2581_v47 }
0x1176   :  { %2176 = vmatprep.subr.bf16.mxu1 %v2484_v0 }
0x117b   :  { %v1343_v14 = vpop.permute.xlu1 %1342 }
0x117c   :  { %2165 = vmatmul.mubr.msk.bf16.vlgmr.msra.gmra.mxu1 %vm115_vm1, %v1343_v14 }
0x117d   :  { %2177 = vmatpush3.bf16.msra.mxu1 %v2541_v11  ;;  %2180 = vmatprep.mubr.msk.bf16.mxu1 %vm2485_vm0, %v2484_v0 }
0x117e   :  { %2178 = vmatprep.subr.bf16.mxu1 %v2484_v0 }
0x1181   :  { %2179 = vmatpush3.bf16.msra.mxu1 %v2545_v15 }
0x1182   :  { %2192 = vmatprep.subr.bf16.mxu1 %v2484_v0 }
0x1184   :  { %2181 = vmatmul.mubr.msk.bf16.vlgmr.msra.gmra.mxu1 %vm115_vm1, %v1343_v14 }
0x1185   :  { %2193 = vmatpush3.bf16.msra.mxu1 %v2564_v41  ;;  %2196 = vmatprep.mubr.msk.bf16.mxu1 %vm2485_vm0, %v2484_v0 }
0x1186   :  { %2194 = vmatprep.subr.bf16.mxu1 %v2484_v0 }
0x1189   :  { %2195 = vmatpush3.bf16.msra.mxu1 %v2567_v42 }
0x118a   :  { %2208 = vmatprep.subr.bf16.mxu1 %v2484_v0 }
0x1230   :  { %v1260_v11 = vpop.f32.mrf.mxu1 }
0x1232   :  { %v2150_v17 = vpop.f32.mrf.mxu1 }
0x1234   :  { %v1263_v18 = vpop.f32.mrf.mxu1 }
0x1236   :  { %v2151_v16 = vpop.f32.mrf.mxu1 }
0x123c   :  { %v1381_v15 = vpop.f32.mrf.mxu1 }
0x123d   :  { %v1382_v19 = vadd.f32 %v1381_v15, %v1260_v11 }
0x123e   :  { %v2166_v20 = vpop.f32.mrf.mxu1 }
0x123f   :  { %v1387_v21 = vadd.f32 %v1382_v19, %v2603_v56 }
0x1240   :  { %v1384_v22 = vpop.f32.mrf.mxu1 }
0x1241   :  { %2325 = vtanh.f32 %v1387_v21  ;;  %v1917_v32 = vmul.f32 -1.442695, %v1387_v21 }
0x1242   :  { %v2167_v41 = vpop.f32.mrf.mxu1 }
0x1244   :  { %v1493_v25 = vpop.f32.mrf.mxu1 }
0x1245   :  { %v1500_v24 = vrot.slane %v1493_v25, 2 }
0x1246   :  { %v2182_v26 = vpop.f32.mrf.mxu1 }
0x1247   :  { %v1502_v27 = vadd.f32 %v1500_v24, %v2555_v23 }
0x1248   :  { %v1496_v42 = vpop.f32.mrf.mxu1 }
0x1249   :  { %2327 = vtanh.f32 %v1502_v27  ;;  %v1920_v31 = vmul.f32 -1.442695, %v1502_v27 }
0x124a   :  { %v2183_v28 = vpop.f32.mrf.mxu1  ;;  %2329 = vpow2.f32 %v1917_v32 }
0x124b   :  { %2331 = vpow2.f32 %v1920_v31 }
0x124e   :  { %v2326_v29 = vpop.eup %2325 }
0x124f   :  { %1397 = vrot.lane.b32.xlu0 %v2326_v29, %s2481_s1 }
0x1256   :  { %v2328_v30 = vpop.eup %2327 }
0x1257   :  { %1515 = vrot.lane.b32.xlu1 %v2328_v30, %s2481_s1  ;;  %v2330_v33 = vpop.eup %2329 }
0x1258   :  { %v1391_v34 = vadd.f32 1.0, %v2330_v33  ;;  %v2332_v35 = vpop.eup %2331 }
0x1259   :  { %v1506_v36 = vadd.f32 1.0, %v2332_v35 }
0x125a   :  { %2333 = vrcp.f32 %v1391_v34 }
0x125b   :  { %2335 = vrcp.f32 %v1506_v36 }
0x1267   :  { %v2334_v37 = vpop.eup %2333 }
0x1268   :  { %v2336_v40 = vpop.eup %2335  ;;  %v1395_v46 = vmul.f32 %v2334_v37, %v2768_v60 }
0x1269   :  { %v1513_v51 = vmul.f32 %v2336_v40, %v1511_v50 }
0x12c1   :  { %v1398_v38 = vpop.permute.xlu0 %1397 }
0x12c2   :  { %v1400_v39 = vmul.f32 %v2334_v37, %v1398_v38 }
0x12c4   :  { %1402 = vrot.lane.b32.xlu0 %v1400_v39, %s2486_s2 }
0x12c9   :  { %v1516_v43 = vpop.permute.xlu1 %1515 }
0x12ca   :  { %v1518_v44 = vmul.f32 %v2336_v40, %v1516_v43 }
0x12cc   :  { %1520 = vrot.lane.b32.xlu1 %v1518_v44, %s2486_s2 }
0x1336   :  { %v1403_v48 = vpop.permute.xlu0 %1402 }
0x1337   :  { %v2807_v49 = vadd.f32 %v1403_v48, %v1395_v46 }
0x1339   :  { %2337 = vtanh.f32 %v2807_v49 }
0x133e   :  { %v1521_v52 = vpop.permute.xlu1 %1520 }
0x133f   :  { %v2811_v53 = vadd.f32 %v1521_v52, %v1513_v51  ;;  %v2367_v52 = vld [vmem:[#allocation7 + $0x28] sm:$0xff]  }
0x1341   :  { %2339 = vtanh.f32 %v2811_v53  ;;  %v1702_v33 = vrot.slane %v2811_v53, 7  ;;  %v2368_v53 = vld [vmem:[#allocation7 + $0x20] sm:$0xff]  }
0x1346   :  { %v2338_v54 = vpop.eup %2337 }
0x1347   :  { %1408 = vrot.lane.b32.xlu0 %v2338_v54, %s2481_s1 }
0x134e   :  { %v2340_v55 = vpop.eup %2339 }
0x134f   :  { %1526 = vrot.lane.b32.xlu1 %v2340_v55, %s2481_s1 }
0x13b9   :  { %v1409_v57 = vpop.permute.xlu0 %1408 }
0x13ba   :  { %v1411_v58 = vmul.f32 %v2334_v37, %v1409_v57 }
0x13bc   :  { %v1412_v59 = vpack.c.bf16 %v1411_v58, %v1411_v58 }
0x13be   :  { %1414 = vrot.lane.b32.xlu0 %v1412_v59, %s2486_s2 }
0x13c1   :  { %v1527_v60 = vpop.permute.xlu1 %1526 }
0x13c2   :  { %v1529_v61 = vmul.f32 %v2336_v40, %v1527_v60 }
0x13c4   :  { %v1530_v62 = vpack.c.bf16 %v1529_v61, %v1529_v61 }
0x13c6   :  { %v1532_v63 = vrot.slane %v1530_v62, 3 }
0x13c8   :  { %1533 = vrot.lane.b32.xlu1 %v1532_v63, %s2486_s2  ;;  %v2369_v63 = vld [vmem:[#allocation8 + $0x2] sm:$0x1] }
0x1430   :  { %v1415_v1 = vpop.permute.xlu0 %1414 }
0x1431   :  { %2173 = vmatmul.mubr.msk.bf16.vlgmr.msra.gmra.mxu0 %vm115_vm1, %v1415_v1 }
0x1432   :  { %2185 = vmatpush3.bf16.msra.mxu0 %v2573_v45  ;;  %2188 = vmatprep.mubr.msk.bf16.mxu0 %vm2485_vm0, %v2484_v0  ;;  %v2366_v45 = vld [vmem:[#allocation7 + $0x10] sm:$0xff]  }
0x1433   :  { %2186 = vmatprep.subr.bf16.mxu0 %v2484_v0 }
0x1436   :  { %2187 = vmatpush3.bf16.msra.mxu0 %v2581_v47 }
0x1437   :  { %2200 = vmatprep.subr.bf16.mxu0 %v2484_v0 }
0x143a   :  { %v1534_v2 = vpop.permute.xlu1 %1533 }
0x143b   :  { %2189 = vmatmul.mubr.msk.bf16.vlgmr.msra.gmra.mxu0 %vm115_vm1, %v1534_v2 }
0x143c   :  { %2201 = vmatpush3.bf16.msra.mxu0 %v2365_v3  ;;  %2204 = vmatprep.mubr.msk.bf16.mxu0 %vm2485_vm0, %v2484_v0 }
0x143d   :  { %2202 = vmatprep.subr.bf16.mxu0 %v2484_v0 }
0x1440   :  { %2203 = vmatpush3.bf16.msra.mxu0 %v2366_v45 }
0x1443   :  { %2205 = vmatmul.mubr.msk.bf16.vlgmr.msra.gmra.mxu0 %vm115_vm1, %v1534_v2 }
0x14f1   :  { %v1453_v4 = vpop.f32.mrf.mxu0 }
0x14f3   :  { %v2174_v5 = vpop.f32.mrf.mxu0 }
0x14f5   :  { %v1456_v6 = vpop.f32.mrf.mxu0 }
0x14f7   :  { %v2175_v47 = vpop.f32.mrf.mxu0 }
0x14fb   :  { %v1572_v7 = vpop.f32.mrf.mxu0 }
0x14fc   :  { %v1573_v9 = vadd.f32 %v1572_v7, %v1453_v4 }
0x14fd   :  { %v2190_v8 = vpop.f32.mrf.mxu0 }
0x14fe   :  { %v1578_v12 = vadd.f32 %v1573_v9, %v2603_v56  ;;  %v1928_v8 = vld [vmem:[#allocation8 + $0x3] ss:$0 sm:$0xff] }
0x14ff   :  { %v1575_v10 = vpop.f32.mrf.mxu0 }
0x1500   :  { %2341 = vtanh.f32 %v1578_v12  ;;  %v1922_v21 = vmul.f32 -1.442695, %v1578_v12 }
0x1501   :  { %v2191_v13 = vpop.f32.mrf.mxu0 }
0x1503   :  { %v1684_v14 = vpop.f32.mrf.mxu0 }
0x1504   :  { %v1691_v11 = vrot.slane %v1684_v14, 1 }
0x1505   :  { %v2206_v17 = vpop.f32.mrf.mxu0 }
0x1506   :  { %v1693_v18 = vadd.f32 %v1691_v11, %v2555_v23 }
0x1507   :  { %v1687_v16 = vpop.f32.mrf.mxu0 }
0x1508   :  { %2343 = vtanh.f32 %v1693_v18  ;;  %v1925_v56 = vmul.f32 -1.442695, %v1693_v18 }
0x1509   :  { %v2207_v15 = vpop.f32.mrf.mxu0  ;;  %2345 = vpow2.f32 %v1922_v21 }
0x150a   :  { %2347 = vpow2.f32 %v1925_v56 }
0x150d   :  { %v2342_v19 = vpop.eup %2341 }
0x150e   :  { %1588 = vrot.lane.b32.xlu0 %v2342_v19, %s2481_s1 }
0x1515   :  { %v2344_v20 = vpop.eup %2343 }
0x1516   :  { %1706 = vrot.lane.b32.xlu1 %v2344_v20, %s2481_s1  ;;  %v2346_v22 = vpop.eup %2345 }
0x1517   :  { %v1582_v41 = vadd.f32 1.0, %v2346_v22  ;;  %v2348_v25 = vpop.eup %2347 }
0x1518   :  { %v1697_v24 = vadd.f32 1.0, %v2348_v25 }
0x1519   :  { %2349 = vrcp.f32 %v1582_v41 }
0x151a   :  { %2351 = vrcp.f32 %v1697_v24 }
0x1526   :  { %v2350_v23 = vpop.eup %2349 }
0x1527   :  { %v2352_v42 = vpop.eup %2351  ;;  %v1586_v30 = vmul.f32 %v2350_v23, %v2807_v49 }
0x1528   :  { %v1704_v34 = vmul.f32 %v2352_v42, %v1702_v33 }
0x1580   :  { %v1589_v26 = vpop.permute.xlu0 %1588 }
0x1581   :  { %v1591_v27 = vmul.f32 %v2350_v23, %v1589_v26  ;;  %v1929_v26 = vld [vmem:[#allocation8 + $0x4] ss:$0 sm:$0xff] }
0x1583   :  { %1593 = vrot.lane.b32.xlu0 %v1591_v27, %s2486_s2 }
0x1588   :  { %v1707_v28 = vpop.permute.xlu1 %1706 }
0x1589   :  { %v1709_v29 = vmul.f32 %v2352_v42, %v1707_v28 }
0x158b   :  { %1711 = vrot.lane.b32.xlu1 %v1709_v29, %s2486_s2 }
0x15f5   :  { %v1594_v32 = vpop.permute.xlu0 %1593 }
0x15f6   :  { %v1596_v31 = vadd.f32 %v1594_v32, %v1586_v30 }
0x15f8   :  { %2353 = vtanh.f32 %v1596_v31 }
0x15fd   :  { %v1712_v35 = vpop.permute.xlu1 %1711 }
0x15fe   :  { %v1714_v36 = vadd.f32 %v1712_v35, %v1704_v34 }
0x1600   :  { %2355 = vtanh.f32 %v1714_v36  ;;  %v1803_v9 = vrot.slane %v1714_v36, 5 }
0x1605   :  { %v2354_v37 = vpop.eup %2353 }
0x1606   :  { %1599 = vrot.lane.b32.xlu0 %v2354_v37, %s2481_s1 }
0x160d   :  { %v2356_v38 = vpop.eup %2355 }
0x160e   :  { %1717 = vrot.lane.b32.xlu1 %v2356_v38, %s2481_s1 }
0x1678   :  { %v1600_v39 = vpop.permute.xlu0 %1599 }
0x1679   :  { %v1602_v40 = vmul.f32 %v2350_v23, %v1600_v39 }
0x167b   :  { %v1603_v43 = vpack.c.bf16 %v1602_v40, %v1602_v40 }
0x167d   :  { %1605 = vrot.lane.b32.xlu0 %v1603_v43, %s2486_s2 }
0x1680   :  { %v1718_v44 = vpop.permute.xlu1 %1717 }
0x1681   :  { %v1720_v46 = vmul.f32 %v2352_v42, %v1718_v44 }
0x1683   :  { %v1721_v48 = vpack.c.bf16 %v1720_v46, %v1720_v46  ;;  %v1797_v15 = vrot.slane %v1720_v46, 7 }
0x1685   :  { %v1723_v49 = vshrl.u32 %v1721_v48, 16 }
0x1687   :  { %v1725_v50 = vrot.slane %v1723_v49, 3 }
0x1689   :  { %1726 = vrot.lane.b32.xlu1 %v1725_v50, %s2486_s2 }
0x16ef   :  { %v1606_v51 = vpop.permute.xlu0 %1605 }
0x16f0   :  { %2197 = vmatmul.mubr.msk.bf16.vlgmr.msra.gmra.mxu1 %vm115_vm1, %v1606_v51 }
0x16f1   :  { %2209 = vmatpush3.bf16.msra.mxu1 %v2367_v52  ;;  %2212 = vmatprep.mubr.msk.bf16.mxu1 %vm2485_vm0, %v2484_v0 }
0x16f2   :  { %2210 = vmatprep.subr.bf16.mxu1 %v2484_v0 }
0x16f5   :  { %2211 = vmatpush3.bf16.msra.mxu1 %v2368_v53 }
0x16fb   :  { %v1727_v54 = vpop.permute.xlu1 %1726 }
0x16fc   :  { %2213 = vmatmul.mubr.msk.bf16.vlgmr.msra.gmra.mxu1 %vm115_vm1, %v1727_v54 }
0x17b0   :  { %v1644_v55 = vpop.f32.mrf.mxu1 }
0x17b2   :  { %v2198_v57 = vpop.f32.mrf.mxu1 }
0x17b4   :  { %v1647_v58 = vpop.f32.mrf.mxu1 }
0x17b6   :  { %v2199_v59 = vpop.f32.mrf.mxu1 }
0x17bc   :  { %v1765_v60 = vpop.f32.mrf.mxu1 }
0x17bd   :  { %v1766_v61 = vadd.f32 %v1765_v60, %v1644_v55 }
0x17be   :  { %v2214_v62 = vpop.f32.mrf.mxu1 }
0x17bf   :  { %v1771_v1 = vadd.f32 %v2369_v63, %v1766_v61 }
0x17c0   :  { %v1768_v2 = vpop.f32.mrf.mxu1 }
0x17c1   :  { %2357 = vtanh.f32 %v1771_v1  ;;  %v1927_v0 = vmul.f32 -1.442695, %v1771_v1 }
0x17c2   :  { %v2215_v3 = vpop.f32.mrf.mxu1 }
0x17c3   :  { %2359 = vpow2.f32 %v1927_v0 }
0x17ce   :  { %v2358_v45 = vpop.eup %2357 }
0x17cf   :  { %1781 = vrot.lane.b32.xlu0 %v2358_v45, %s2481_s1 }
0x17d0   :  { %v2360_v4 = vpop.eup %2359 }
0x17d1   :  { %v1775_v5 = vadd.f32 1.0, %v2360_v4 }
0x17d3   :  { %2361 = vrcp.f32 %v1775_v5 }
0x17e0   :  { %v2362_v6 = vpop.eup %2361 }
0x17e1   :  { %v1779_v12 = vmul.f32 %v2362_v6, %v1596_v31 }
0x1841   :  { %v1782_v47 = vpop.permute.xlu0 %1781 }
0x1842   :  { %v1784_v7 = vmul.f32 %v2362_v6, %v1782_v47 }
0x1844   :  { %1786 = vrot.lane.b32.xlu1 %v1784_v7, %s2486_s2 }
0x1848   :  { %1804 = vrot.lane.b32.xlu1 %v1803_v9, %s2481_s1 }
0x184c   :  { %1823 = vrot.lane.b32.xlu1 %v1928_v8, %s2487_s3 }
0x18b6   :  { %v1787_v10 = vpop.permute.xlu1 %1786 }
0x18b7   :  { %v1789_v13 = vadd.f32 %v1787_v10, %v1779_v12 }
0x18b9   :  { %2363 = vtanh.f32 %v1789_v13  ;;  %v1808_v11 = vrot.slane %v1789_v13, 5 }
0x18ba   :  { %v1805_v18 = vpop.permute.xlu1 %1804 }
0x18be   :  { %v1824_v21 = vpop.permute.xlu1 %1823 }
0x18c6   :  { %v2364_v14 = vpop.eup %2363 }
0x18c7   :  { %1792 = vrot.lane.b32.xlu0 %v2364_v14, %s2481_s1 }
0x18cb   :  { %1809 = vrot.lane.b32.xlu0 %v1808_v11, %s2481_s1 }
0x1939   :  { %v1793_v17 = vpop.permute.xlu0 %1792 }
0x193a   :  { %v1795_v16 = vmul.f32 %v2362_v6, %v1793_v17 }
0x193c   :  { %v1800_v19 = vrot.slane %v1795_v16, 7 }
0x193d   :  { %v1810_v56 = vpop.permute.xlu0 %1809 }
0x193e   :  { %v1813_v20 = vsel %vm1812_vm2, %v1797_v15, %v1800_v19 }
0x193f   :  { %v1815_v22 = vsel %vm1814_vm3, %v1813_v20, %v1805_v18 }
0x1940   :  { %v1817_v41 = vsel %vm1816_vm4, %v1815_v22, %v1810_v56 }
0x1941   :  { %v1826_v25 = vmul.f32 %v1824_v21, %v1817_v41 }
0x1943   :  { %1828 = vrot.lane.b32.xlu0 %v1826_v25, %s2486_s2 }
0x19b5   :  { %v1829_v24 = vpop.permute.xlu0 %1828 }
0x19b6   :  { %v1832_v23 = vsel %vm1831_vm5, %v1829_v24, 0.0 }
0x19b7   :  { %1833 = vadd.xlane.f32.xlu1 %v1832_v23 }
0x1a40   :  { %v1834_v27 = vpop.xlane.xlu1 %1833 }
0x1a41   :  { %v1839_v42 = vadd.f32 %v1929_v26, %v1834_v27 }
0x1a43   :  { %v1841_v28 = vsel %vm1840_vm6, %v1839_v42, 0.0 }
0x1a44   :  { %v1843_v29 = vrot.slane %v1841_v28, 4 }
0x1a46   :  { %1844 = vrot.lane.b32.xlu0 %v1843_v29, %s2487_s3 }
0x1ab8   :  { %v1845_v30 = vpop.permute.xlu0 %1844 }
0x1ab9   :  { %v1848_v32 = vsel %vm1847_vm7, %v1817_v41, %v1845_v30 }
0x1aba   :  { %v1850_v31 = vsel %vm1849_vm8, %v1848_v32, 0.0 }
0x1abb   :  { %1852 = vrot.lane.b32.xlu0 %v1850_v31, %s2486_s2 }
0x1b2d   :  { %v1853_v33 = vpop.permute.xlu0 %1852 }
0x1b2e   :  { %v1855_v34 = vsel %vm115_vm1, %v1853_v33, 0.0 }
0x1b2f   :  { %1856 = vst [vmem:[#allocation10] sm:$0xff] %v1855_v34 }
0x1b30   :  { %2461 = shalt.err (!%p2458_p10)
}
0x1b31   :  { %1866 = dma.vmem_to_hbm [thread:$0]  %s1864_s10, 128, %s2864_s4, [#allocation4]  }
0x1b32   :  { %2476 = dma.done.wait [#allocation4], 128  }
0x1b33   :  { %2477 = vsyncadd [#allocation4], 4294967168 }
0x1b34   :  { %1870 = vsyncpa [#allocation3], 1 }
0x1b35   :  { %1871 = vsyncpa [#allocation6], 1 }
0x1b36   :  { %1872 = vsyncpa [#allocation9], 1 }
0x1b37   :  { %1873 = vsyncpa [#allocation4], 1 }

</bundles_post_ra>
